<compile_context>
chip_gen: v6e
topology: v6e:2x2x1
jax: 0.10.0
libtpu: 0.0.40
codegen_flags: <defaults>
</compile_context>

<pallas_src>
import functools

import jax
import jax.numpy as jnp
from jax.experimental import pallas as pl
from jax.experimental.pallas import tpu as pltpu


def context_ntm_kernel(
    x_ref, ls_ref, eps_ref,
    w11xs_ref, w11c_ref, b11_ref,
    w12_ref, b12_ref,
    w2122_ref, b2122_ref,
    wg_ref, bg_ref,
    wd1_ref, bd1_ref,
    packed_ref, d_ref,
    *, use_bf16_exp,
):
    f32 = jnp.float32
    bf16 = jnp.bfloat16
    H = b11_ref.shape[1]
    T = bg_ref.shape[1] // 4

    def mm(act, w):
        # bf16 x bf16 MXU matmul with f32 accumulation.
        return jnp.dot(act.astype(bf16), w, preferred_element_type=f32)

    x = x_ref[...]
    ls = ls_ref[...]

    # ---- encode ----
    # fc11(cat(x, ls)) split into x-part (fused with fcs) and latent-state part:
    #   hx = x @ [W11_x | Ws]  -> [tb, 2H] lane-dense
    hx = mm(x, w11xs_ref[...])
    e1 = jnp.maximum(hx[:, :H] + mm(ls, w11c_ref[...]) + b11_ref[...], 0.0)  # relu(fc11)
    e1 = jnp.maximum(mm(e1, w12_ref[...]) + b12_ref[...], 0.0)               # relu(fc12)
    e1 = e1 + hx[:, H:]                                                      # + fcs(x)

    # fc21 | fc22 fused: one [H, 2T] dot; ml = [mu | logvar], kept contiguous.
    ml = mm(e1, w2122_ref[...]) + b2122_ref[...]

    # ---- reparameterize (training semantics; eps pre-sampled outside) ----
    z = eps_ref[...] * jnp.exp(0.5 * ml[:, T:]) + ml[:, :T]

    # ---- generate: 4x tanh(Linear) + residual, one packed [T, 4T] weight ----
    wg = wg_ref[...]
    bg = bg_ref[...]
    g = z
    for i in range(4):
        g = jnp.tanh(mm(g, wg[:, i * T:(i + 1) * T]) + bg[:, i * T:(i + 1) * T])
    g = g + z

    # ---- decode: softmax(fcd1(g), dim=1) ----
    logits = mm(g, wd1_ref[...]) + bd1_ref[...]
    m = jnp.max(logits, axis=1, keepdims=True)
    shifted = logits - m
    if use_bf16_exp:
        # bf16 EUP path (v6e/v7x); reduction and normalization stay f32.
        p = jnp.exp(shifted.astype(bf16)).astype(f32)
    else:
        p = jnp.exp(shifted)
    d = p / jnp.sum(p, axis=1, keepdims=True)  # exact; softmax runs only once

    # Lane-dense packed output: [z | g | mu | logvar] -> [tb, 4T] (= 128 lanes),
    # mu/logvar come straight from ml without a re-split / re-concat.
    packed_ref[...] = jnp.concatenate([z, g, ml], axis=1)
    d_ref[...] = d


def _device_kind():
    try:
        return jax.devices()[0].device_kind.lower()
    except Exception:
        return ""


def _pick_batch_tile(batch, cores_per_chip):
    """grid=(1,) on single-TC chips; exactly one tile per TC on v7x."""
    if cores_per_chip > 1 and batch % cores_per_chip == 0 and (batch // cores_per_chip) % 8 == 0:
        return batch // cores_per_chip
    return batch


def context_ntm_forward(x, latent_state, eps, fused, *, batch_tile=None, use_bf16_exp=None):
    """x: [B, V]; latent_state: [B, bert]; eps: [B, T]; fused: dict of fused weights."""
    B, V = x.shape
    bert = latent_state.shape[1]
    T = eps.shape[1]
    H = fused["b11"].shape[1]

    kind = _device_kind()
    cores_per_chip = 2 if "v7" in kind else 1          # v7x has 2 TCs/chip
    if use_bf16_exp is None:
        use_bf16_exp = ("v6" in kind) or ("v7" in kind)  # bf16 EUP; never on v5e

    tb = _pick_batch_tile(B, cores_per_chip) if batch_tile is None else batch_tile
    assert B % tb == 0, "batch must be a multiple of the batch tile"
    grid = (B // tb,)

    def batch_spec(cols):
        return pl.BlockSpec((tb, cols), lambda i: (i, 0))

    def const_spec(arr):
        r, c = arr.shape
        return pl.BlockSpec((r, c), lambda i: (0, 0))  # weight stays VMEM-resident

    weight_order = [
        "w11xs", "w11c", "b11", "w12", "b12", "w2122", "b2122",
        "wg", "bg", "wd1", "bd1",
    ]
    weights = [fused[k] for k in weight_order]

    in_specs = [batch_spec(V), batch_spec(bert), batch_spec(T)]
    in_specs += [const_spec(w) for w in weights]

    out_shape = (
        jax.ShapeDtypeStruct((B, 4 * T), jnp.float32),  # packed [z | g | mu | logvar]
        jax.ShapeDtypeStruct((B, V), jnp.float32),      # decoded softmax
    )
    out_specs = (batch_spec(4 * T), batch_spec(V))

    flops = 2 * B * (V * 2 * H + bert * H + H * H + H * 2 * T + 4 * T * T + T * V)
    transcendentals = B * (T + 4 * T + V)  # exp(std), 4x tanh, softmax exp
    bytes_accessed = int(
        x.size * x.dtype.itemsize
        + latent_state.size * latent_state.dtype.itemsize
        + eps.size * eps.dtype.itemsize
        + sum(int(w.size) * int(w.dtype.itemsize) for w in weights)
        + B * 4 * T * 4
        + B * V * 4
    )

    packed, d = pl.pallas_call(
        functools.partial(context_ntm_kernel, use_bf16_exp=use_bf16_exp),
        grid=grid,
        in_specs=in_specs,
        out_specs=out_specs,
        out_shape=out_shape,
        compiler_params=pltpu.CompilerParams(
            dimension_semantics=("parallel",),  # batch axis -> both TCs on v7x
        ),
        cost_estimate=pl.CostEstimate(
            flops=int(flops),
            transcendentals=int(transcendentals),
            bytes_accessed=bytes_accessed,
        ),
    )(x, latent_state, eps, *weights)

    z = packed[:, 0 * T:1 * T]
    g = packed[:, 1 * T:2 * T]
    mu = packed[:, 2 * T:3 * T]
    logvar = packed[:, 3 * T:4 * T]
    return z, g, d, mu, logvar


def init_params(key, bow_vocab_size, bert_size, topic_num, hidden_dim):
    """Deterministic parameter init. Weights stored pre-transposed as [in, out].
    fc11 rows 0:V correspond to x, rows V: to latent_state (cat(x, latent_state))."""
    def linear(k, fan_in, fan_out, bias=True):
        kw, kb = jax.random.split(k)
        bound = 1.0 / jnp.sqrt(fan_in)
        w = jax.random.uniform(kw, (fan_in, fan_out), jnp.float32, -bound, bound)
        if bias:
            b = jax.random.uniform(kb, (1, fan_out), jnp.float32, -bound, bound)
            return w, b
        return w, None

    keys = jax.random.split(key, 10)
    p = {}
    p["w11"], p["b11"] = linear(keys[0], bow_vocab_size + bert_size, hidden_dim)
    p["w12"], p["b12"] = linear(keys[1], hidden_dim, hidden_dim)
    p["w21"], p["b21"] = linear(keys[2], hidden_dim, topic_num)
    p["w22"], p["b22"] = linear(keys[3], hidden_dim, topic_num)
    p["ws"], _ = linear(keys[4], bow_vocab_size, hidden_dim, bias=False)
    p["wg1"], p["bg1"] = linear(keys[5], topic_num, topic_num)
    p["wg2"], p["bg2"] = linear(keys[6], topic_num, topic_num)
    p["wg3"], p["bg3"] = linear(keys[7], topic_num, topic_num)
    p["wg4"], p["bg4"] = linear(keys[8], topic_num, topic_num)
    p["wd1"], p["bd1"] = linear(keys[9], topic_num, bow_vocab_size)
    # ContextNTM also defines adapt_layer and dropout, but neither is used in
    # forward(), so they are intentionally omitted here.
    return p


def fuse_params(params, bow_vocab_size, weight_dtype=jnp.bfloat16):
    """Fuse parallel matmuls into lane-dense weights and cast to bf16."""
    V = bow_vocab_size
    w11 = params["w11"]
    fused = {
        # fc11 x-columns fused with fcs -> single [V, 2H] x-contraction.
        "w11xs": jnp.concatenate([w11[:V], params["ws"]], axis=1).astype(weight_dtype),
        "w11c": w11[V:].astype(weight_dtype),          # fc11 latent_state columns
        "b11": params["b11"],
        "w12": params["w12"].astype(weight_dtype),
        "b12": params["b12"],
        # fc21 | fc22 fused -> [H, 2T].
        "w2122": jnp.concatenate([params["w21"], params["w22"]], axis=1).astype(weight_dtype),
        "b2122": jnp.concatenate([params["b21"], params["b22"]], axis=1),
        # fcg1..fcg4 packed into one lane-dense [T, 4T] slab (and [1, 4T] bias).
        "wg": jnp.concatenate(
            [params[f"wg{i}"] for i in (1, 2, 3, 4)], axis=1).astype(weight_dtype),
        "bg": jnp.concatenate([params[f"bg{i}"] for i in (1, 2, 3, 4)], axis=1),
        "wd1": params["wd1"].astype(weight_dtype),
        "bd1": params["bd1"],
    }
    return fused


def context_ntm_reference(x, ls, eps, fused):
    """Pure-JAX reference mirroring the kernel's bf16-weight / f32-accum math."""
    f32 = jnp.float32
    bf16 = jnp.bfloat16
    H = fused["b11"].shape[1]
    T = fused["wg"].shape[0]

    def mm(a, w):
        return jnp.dot(a.astype(bf16), w, preferred_element_type=f32)

    hx = mm(x, fused["w11xs"])
    e1 = jnp.maximum(hx[:, :H] + mm(ls, fused["w11c"]) + fused["b11"], 0.0)
    e1 = jnp.maximum(mm(e1, fused["w12"]) + fused["b12"], 0.0)
    e1 = e1 + hx[:, H:]
    ml = mm(e1, fused["w2122"]) + fused["b2122"]
    mu, logvar = ml[:, :T], ml[:, T:]
    z = eps * jnp.exp(0.5 * logvar) + mu
    g = z
    for i in range(4):
        g = jnp.tanh(mm(g, fused["wg"][:, i * T:(i + 1) * T])
                     + fused["bg"][:, i * T:(i + 1) * T])
    g = g + z
    logits = mm(g, fused["wd1"]) + fused["bd1"]
    d = jax.nn.softmax(logits, axis=1)
    return z, g, d, mu, logvar


if __name__ == "__main__":
    # Module-consistent small shapes; batch chosen so both the single-grid-step
    # (v5e/v6e) and two-tile (v7x) paths tile cleanly.
    B, V, BERT, T, H = 128, 256, 128, 32, 64  # batch, bow_vocab, bert_size, topic_num, hidden

    key = jax.random.PRNGKey(0)
    k_x, k_ls, k_eps, k_p = jax.random.split(key, 4)

    x = jax.random.uniform(k_x, (B, V), jnp.float32, 0.0, 3.0)   # bag-of-words style input
    latent_state = jax.random.normal(k_ls, (B, BERT), jnp.float32)
    eps = jax.random.normal(k_eps, (B, T), jnp.float32)          # training-mode noise

    params = init_params(k_p, V, BERT, T, H)
    fused = fuse_params(params, V)

    z, g, d, mu, logvar = context_ntm_forward(x, latent_state, eps, fused)
    jax.block_until_ready((z, g, d, mu, logvar))

    # Decoded distribution rows sum to 1 (exact normalization now).
    assert jnp.allclose(jnp.sum(d, axis=1), 1.0, atol=1e-3)

    # Cross-check against a pure-JAX reference using the same bf16 weights.
    zr, gr, dr, mur, lvr = context_ntm_reference(x, latent_state, eps, fused)
    assert jnp.allclose(d, dr, atol=1e-2, rtol=1e-2)
    for got, ref in ((z, zr), (g, gr), (mu, mur), (logvar, lvr)):
        assert jnp.allclose(got, ref, atol=5e-2, rtol=5e-2)

    print("KERNEL_OK")
</pallas_src>

<mosaic_0001>
module attributes {stable_mosaic.version = 11 : i64} {
  func.func @context_ntm_kernel(%arg0: i32, %arg1: memref<128x256xf32, #tpu.memory_space<vmem>>, %arg2: memref<128x128xf32, #tpu.memory_space<vmem>>, %arg3: memref<128x32xf32, #tpu.memory_space<vmem>>, %arg4: memref<256x128xbf16, #tpu.memory_space<vmem>>, %arg5: memref<128x64xbf16, #tpu.memory_space<vmem>>, %arg6: memref<1x64xf32, #tpu.memory_space<vmem>>, %arg7: memref<64x64xbf16, #tpu.memory_space<vmem>>, %arg8: memref<1x64xf32, #tpu.memory_space<vmem>>, %arg9: memref<64x64xbf16, #tpu.memory_space<vmem>>, %arg10: memref<1x64xf32, #tpu.memory_space<vmem>>, %arg11: memref<32x128xbf16, #tpu.memory_space<vmem>>, %arg12: memref<1x128xf32, #tpu.memory_space<vmem>>, %arg13: memref<32x256xbf16, #tpu.memory_space<vmem>>, %arg14: memref<1x256xf32, #tpu.memory_space<vmem>>, %arg15: memref<128x128xf32, #tpu.memory_space<vmem>>, %arg16: memref<128x256xf32, #tpu.memory_space<vmem>>) attributes {dimension_semantics = [#tpu.dimension_semantics<parallel>], iteration_bounds = array<i64: 1>, scalar_prefetch = 0 : i64, scratch_operands = 0 : i64, tpu.core_type = #tpu.core_type<tc>, window_params = [{transform_indices = @transform_0, window_bounds = array<i64: 128, 256>}, {transform_indices = @transform_1, window_bounds = array<i64: 128, 128>}, {transform_indices = @transform_2, window_bounds = array<i64: 128, 32>}, {pipeline_mode = #tpu.pipeline_mode<synchronous>, transform_indices = @transform_3, window_bounds = array<i64: 256, 128>}, {pipeline_mode = #tpu.pipeline_mode<synchronous>, transform_indices = @transform_4, window_bounds = array<i64: 128, 64>}, {pipeline_mode = #tpu.pipeline_mode<synchronous>, transform_indices = @transform_5, window_bounds = array<i64: 1, 64>}, {pipeline_mode = #tpu.pipeline_mode<synchronous>, transform_indices = @transform_6, window_bounds = array<i64: 64, 64>}, {pipeline_mode = #tpu.pipeline_mode<synchronous>, transform_indices = @transform_7, window_bounds = array<i64: 1, 64>}, {pipeline_mode = #tpu.pipeline_mode<synchronous>, transform_indices = @transform_8, window_bounds = array<i64: 64, 64>}, {pipeline_mode = #tpu.pipeline_mode<synchronous>, transform_indices = @transform_9, window_bounds = array<i64: 1, 64>}, {pipeline_mode = #tpu.pipeline_mode<synchronous>, transform_indices = @transform_10, window_bounds = array<i64: 32, 128>}, {pipeline_mode = #tpu.pipeline_mode<synchronous>, transform_indices = @transform_11, window_bounds = array<i64: 1, 128>}, {pipeline_mode = #tpu.pipeline_mode<synchronous>, transform_indices = @transform_12, window_bounds = array<i64: 32, 256>}, {pipeline_mode = #tpu.pipeline_mode<synchronous>, transform_indices = @transform_13, window_bounds = array<i64: 1, 256>}, {transform_indices = @transform_14, window_bounds = array<i64: 128, 128>}, {transform_indices = @transform_15, window_bounds = array<i64: 128, 256>}]} {
    %c0 = arith.constant 0 : index
    %c0_0 = arith.constant 0 : index
    %0 = vector.load %arg1[%c0, %c0_0] : memref<128x256xf32, #tpu.memory_space<vmem>>, vector<128x256xf32>
    %c0_1 = arith.constant 0 : index
    %c0_2 = arith.constant 0 : index
    %1 = vector.load %arg2[%c0_1, %c0_2] : memref<128x128xf32, #tpu.memory_space<vmem>>, vector<128x128xf32>
    %c0_3 = arith.constant 0 : index
    %c0_4 = arith.constant 0 : index
    %2 = vector.load %arg4[%c0_3, %c0_4] : memref<256x128xbf16, #tpu.memory_space<vmem>>, vector<256x128xbf16>
    %3 = arith.truncf %0 : vector<128x256xf32> to vector<128x256xbf16>
    %cst = arith.constant dense<0.000000e+00> : vector<128x128xf32>
    %4 = tpu.matmul %3, %2, %cst {dimension_numbers = #tpu.dot_dimension_numbers<[1], [0], [0], [1], [0, 0, 1, 1], [], []>} : vector<128x256xbf16>, vector<256x128xbf16>, vector<128x128xf32> -> vector<128x128xf32>
    %5 = vector.extract_strided_slice %4 {offsets = [0, 0], sizes = [128, 64], strides = [1, 1]} : vector<128x128xf32> to vector<128x64xf32>
    %c0_5 = arith.constant 0 : index
    %c0_6 = arith.constant 0 : index
    %6 = vector.load %arg5[%c0_5, %c0_6] : memref<128x64xbf16, #tpu.memory_space<vmem>>, vector<128x64xbf16>
    %7 = arith.truncf %1 : vector<128x128xf32> to vector<128x128xbf16>
    %cst_7 = arith.constant dense<0.000000e+00> : vector<128x64xf32>
    %8 = tpu.matmul %7, %6, %cst_7 {dimension_numbers = #tpu.dot_dimension_numbers<[1], [0], [0], [1], [0, 0, 1, 1], [], []>} : vector<128x128xbf16>, vector<128x64xbf16>, vector<128x64xf32> -> vector<128x64xf32>
    %9 = arith.addf %5, %8 : vector<128x64xf32>
    %c0_8 = arith.constant 0 : index
    %c0_9 = arith.constant 0 : index
    %10 = vector.load %arg6[%c0_8, %c0_9] : memref<1x64xf32, #tpu.memory_space<vmem>>, vector<1x64xf32>
    %11 = vector.broadcast %10 : vector<1x64xf32> to vector<128x64xf32>
    %12 = arith.addf %9, %11 : vector<128x64xf32>
    %cst_10 = arith.constant 0.000000e+00 : f32
    %13 = vector.broadcast %cst_10 : f32 to vector<128x64xf32>
    %14 = arith.maximumf %12, %13 : vector<128x64xf32>
    %c0_11 = arith.constant 0 : index
    %c0_12 = arith.constant 0 : index
    %15 = vector.load %arg7[%c0_11, %c0_12] : memref<64x64xbf16, #tpu.memory_space<vmem>>, vector<64x64xbf16>
    %16 = arith.truncf %14 : vector<128x64xf32> to vector<128x64xbf16>
    %cst_13 = arith.constant dense<0.000000e+00> : vector<128x64xf32>
    %17 = tpu.matmul %16, %15, %cst_13 {dimension_numbers = #tpu.dot_dimension_numbers<[1], [0], [0], [1], [0, 0, 1, 1], [], []>} : vector<128x64xbf16>, vector<64x64xbf16>, vector<128x64xf32> -> vector<128x64xf32>
    %c0_14 = arith.constant 0 : index
    %c0_15 = arith.constant 0 : index
    %18 = vector.load %arg8[%c0_14, %c0_15] : memref<1x64xf32, #tpu.memory_space<vmem>>, vector<1x64xf32>
    %19 = vector.broadcast %18 : vector<1x64xf32> to vector<128x64xf32>
    %20 = arith.addf %17, %19 : vector<128x64xf32>
    %cst_16 = arith.constant 0.000000e+00 : f32
    %21 = vector.broadcast %cst_16 : f32 to vector<128x64xf32>
    %22 = arith.maximumf %20, %21 : vector<128x64xf32>
    %23 = vector.extract_strided_slice %4 {offsets = [0, 64], sizes = [128, 64], strides = [1, 1]} : vector<128x128xf32> to vector<128x64xf32>
    %24 = arith.addf %22, %23 : vector<128x64xf32>
    %c0_17 = arith.constant 0 : index
    %c0_18 = arith.constant 0 : index
    %25 = vector.load %arg9[%c0_17, %c0_18] : memref<64x64xbf16, #tpu.memory_space<vmem>>, vector<64x64xbf16>
    %26 = arith.truncf %24 : vector<128x64xf32> to vector<128x64xbf16>
    %cst_19 = arith.constant dense<0.000000e+00> : vector<128x64xf32>
    %27 = tpu.matmul %26, %25, %cst_19 {dimension_numbers = #tpu.dot_dimension_numbers<[1], [0], [0], [1], [0, 0, 1, 1], [], []>} : vector<128x64xbf16>, vector<64x64xbf16>, vector<128x64xf32> -> vector<128x64xf32>
    %c0_20 = arith.constant 0 : index
    %c0_21 = arith.constant 0 : index
    %28 = vector.load %arg10[%c0_20, %c0_21] : memref<1x64xf32, #tpu.memory_space<vmem>>, vector<1x64xf32>
    %29 = vector.broadcast %28 : vector<1x64xf32> to vector<128x64xf32>
    %30 = arith.addf %27, %29 : vector<128x64xf32>
    %c0_22 = arith.constant 0 : index
    %c0_23 = arith.constant 0 : index
    %31 = vector.load %arg3[%c0_22, %c0_23] : memref<128x32xf32, #tpu.memory_space<vmem>>, vector<128x32xf32>
    %32 = vector.extract_strided_slice %30 {offsets = [0, 32], sizes = [128, 32], strides = [1, 1]} : vector<128x64xf32> to vector<128x32xf32>
    %cst_24 = arith.constant 5.000000e-01 : f32
    %33 = vector.broadcast %cst_24 : f32 to vector<128x32xf32>
    %34 = arith.mulf %33, %32 : vector<128x32xf32>
    %35 = math.exp %34 : vector<128x32xf32>
    %36 = arith.mulf %31, %35 : vector<128x32xf32>
    %37 = vector.extract_strided_slice %30 {offsets = [0, 0], sizes = [128, 32], strides = [1, 1]} : vector<128x64xf32> to vector<128x32xf32>
    %38 = arith.addf %36, %37 : vector<128x32xf32>
    %c0_25 = arith.constant 0 : index
    %c0_26 = arith.constant 0 : index
    %39 = vector.load %arg11[%c0_25, %c0_26] : memref<32x128xbf16, #tpu.memory_space<vmem>>, vector<32x128xbf16>
    %c0_27 = arith.constant 0 : index
    %c0_28 = arith.constant 0 : index
    %40 = vector.load %arg12[%c0_27, %c0_28] : memref<1x128xf32, #tpu.memory_space<vmem>>, vector<1x128xf32>
    %41 = vector.extract_strided_slice %39 {offsets = [0, 0], sizes = [32, 32], strides = [1, 1]} : vector<32x128xbf16> to vector<32x32xbf16>
    %42 = arith.truncf %38 : vector<128x32xf32> to vector<128x32xbf16>
    %cst_29 = arith.constant dense<0.000000e+00> : vector<128x32xf32>
    %43 = tpu.matmul %42, %41, %cst_29 {dimension_numbers = #tpu.dot_dimension_numbers<[1], [0], [0], [1], [0, 0, 1, 1], [], []>} : vector<128x32xbf16>, vector<32x32xbf16>, vector<128x32xf32> -> vector<128x32xf32>
    %44 = vector.extract_strided_slice %40 {offsets = [0, 0], sizes = [1, 32], strides = [1, 1]} : vector<1x128xf32> to vector<1x32xf32>
    %45 = vector.broadcast %44 : vector<1x32xf32> to vector<128x32xf32>
    %46 = arith.addf %43, %45 : vector<128x32xf32>
    %47 = math.tanh %46 : vector<128x32xf32>
    %48 = vector.extract_strided_slice %39 {offsets = [0, 32], sizes = [32, 32], strides = [1, 1]} : vector<32x128xbf16> to vector<32x32xbf16>
    %49 = arith.truncf %47 : vector<128x32xf32> to vector<128x32xbf16>
    %cst_30 = arith.constant dense<0.000000e+00> : vector<128x32xf32>
    %50 = tpu.matmul %49, %48, %cst_30 {dimension_numbers = #tpu.dot_dimension_numbers<[1], [0], [0], [1], [0, 0, 1, 1], [], []>} : vector<128x32xbf16>, vector<32x32xbf16>, vector<128x32xf32> -> vector<128x32xf32>
    %51 = vector.extract_strided_slice %40 {offsets = [0, 32], sizes = [1, 32], strides = [1, 1]} : vector<1x128xf32> to vector<1x32xf32>
    %52 = vector.broadcast %51 : vector<1x32xf32> to vector<128x32xf32>
    %53 = arith.addf %50, %52 : vector<128x32xf32>
    %54 = math.tanh %53 : vector<128x32xf32>
    %55 = vector.extract_strided_slice %39 {offsets = [0, 64], sizes = [32, 32], strides = [1, 1]} : vector<32x128xbf16> to vector<32x32xbf16>
    %56 = arith.truncf %54 : vector<128x32xf32> to vector<128x32xbf16>
    %cst_31 = arith.constant dense<0.000000e+00> : vector<128x32xf32>
    %57 = tpu.matmul %56, %55, %cst_31 {dimension_numbers = #tpu.dot_dimension_numbers<[1], [0], [0], [1], [0, 0, 1, 1], [], []>} : vector<128x32xbf16>, vector<32x32xbf16>, vector<128x32xf32> -> vector<128x32xf32>
    %58 = vector.extract_strided_slice %40 {offsets = [0, 64], sizes = [1, 32], strides = [1, 1]} : vector<1x128xf32> to vector<1x32xf32>
    %59 = vector.broadcast %58 : vector<1x32xf32> to vector<128x32xf32>
    %60 = arith.addf %57, %59 : vector<128x32xf32>
    %61 = math.tanh %60 : vector<128x32xf32>
    %62 = vector.extract_strided_slice %39 {offsets = [0, 96], sizes = [32, 32], strides = [1, 1]} : vector<32x128xbf16> to vector<32x32xbf16>
    %63 = arith.truncf %61 : vector<128x32xf32> to vector<128x32xbf16>
    %cst_32 = arith.constant dense<0.000000e+00> : vector<128x32xf32>
    %64 = tpu.matmul %63, %62, %cst_32 {dimension_numbers = #tpu.dot_dimension_numbers<[1], [0], [0], [1], [0, 0, 1, 1], [], []>} : vector<128x32xbf16>, vector<32x32xbf16>, vector<128x32xf32> -> vector<128x32xf32>
    %65 = vector.extract_strided_slice %40 {offsets = [0, 96], sizes = [1, 32], strides = [1, 1]} : vector<1x128xf32> to vector<1x32xf32>
    %66 = vector.broadcast %65 : vector<1x32xf32> to vector<128x32xf32>
    %67 = arith.addf %64, %66 : vector<128x32xf32>
    %68 = math.tanh %67 : vector<128x32xf32>
    %69 = arith.addf %68, %38 : vector<128x32xf32>
    %c0_33 = arith.constant 0 : index
    %c0_34 = arith.constant 0 : index
    %70 = vector.load %arg13[%c0_33, %c0_34] : memref<32x256xbf16, #tpu.memory_space<vmem>>, vector<32x256xbf16>
    %71 = arith.truncf %69 : vector<128x32xf32> to vector<128x32xbf16>
    %cst_35 = arith.constant dense<0.000000e+00> : vector<128x256xf32>
    %72 = tpu.matmul %71, %70, %cst_35 {dimension_numbers = #tpu.dot_dimension_numbers<[1], [0], [0], [1], [0, 0, 1, 1], [], []>} : vector<128x32xbf16>, vector<32x256xbf16>, vector<128x256xf32> -> vector<128x256xf32>
    %c0_36 = arith.constant 0 : index
    %c0_37 = arith.constant 0 : index
    %73 = vector.load %arg14[%c0_36, %c0_37] : memref<1x256xf32, #tpu.memory_space<vmem>>, vector<1x256xf32>
    %74 = vector.broadcast %73 : vector<1x256xf32> to vector<128x256xf32>
    %75 = arith.addf %72, %74 : vector<128x256xf32>
    %cst_38 = arith.constant dense<0xFF800000> : vector<128xf32>
    %76 = vector.multi_reduction <maximumf>, %75, %cst_38 [1] : vector<128x256xf32> to vector<128xf32>
    %77 = vector.shape_cast %76 : vector<128xf32> to vector<128x1xf32>
    %78 = vector.broadcast %77 : vector<128x1xf32> to vector<128x256xf32>
    %79 = arith.subf %75, %78 : vector<128x256xf32>
    %80 = math.exp %79 : vector<128x256xf32>
    %cst_39 = arith.constant dense<0.000000e+00> : vector<128xf32>
    %81 = vector.multi_reduction <add>, %80, %cst_39 [1] : vector<128x256xf32> to vector<128xf32>
    %82 = vector.shape_cast %81 : vector<128xf32> to vector<128x1xf32>
    %83 = vector.broadcast %82 : vector<128x1xf32> to vector<128x256xf32>
    %84 = arith.divf %80, %83 : vector<128x256xf32>
    %85 = tpu.concatenate %38, %69, %30 in 1 : vector<128x32xf32>, vector<128x32xf32>, vector<128x64xf32> -> vector<128x128xf32>
    %c0_40 = arith.constant 0 : index
    %c0_41 = arith.constant 0 : index
    %86 = vector.load %arg15[%c0_40, %c0_41] : memref<128x128xf32, #tpu.memory_space<vmem>>, vector<128x128xf32>
    tpu.vector_store %arg15[%c0_40, %c0_41], %85 {strides = array<i32>} : memref<128x128xf32, #tpu.memory_space<vmem>>, vector<128x128xf32>,
    %c0_42 = arith.constant 0 : index
    %c0_43 = arith.constant 0 : index
    %87 = vector.load %arg16[%c0_42, %c0_43] : memref<128x256xf32, #tpu.memory_space<vmem>>, vector<128x256xf32>
    tpu.vector_store %arg16[%c0_42, %c0_43], %84 {strides = array<i32>} : memref<128x256xf32, #tpu.memory_space<vmem>>, vector<128x256xf32>,
    return
  }
  func.func @transform_0(%arg0: i32) -> (i32, i32) {
    %c0_i32 = arith.constant 0 : i32
    %c0_i32_0 = arith.constant 0 : i32
    return %arg0, %c0_i32 : i32, i32
  }
  func.func @transform_1(%arg0: i32) -> (i32, i32) {
    %c0_i32 = arith.constant 0 : i32
    %c0_i32_0 = arith.constant 0 : i32
    return %arg0, %c0_i32 : i32, i32
  }
  func.func @transform_2(%arg0: i32) -> (i32, i32) {
    %c0_i32 = arith.constant 0 : i32
    %c0_i32_0 = arith.constant 0 : i32
    return %arg0, %c0_i32 : i32, i32
  }
  func.func @transform_3(%arg0: i32) -> (i32, i32) {
    %c0_i32 = arith.constant 0 : i32
    %c0_i32_0 = arith.constant 0 : i32
    %c0_i32_1 = arith.constant 0 : i32
    return %c0_i32, %c0_i32_0 : i32, i32
  }
  func.func @transform_4(%arg0: i32) -> (i32, i32) {
    %c0_i32 = arith.constant 0 : i32
    %c0_i32_0 = arith.constant 0 : i32
    %c0_i32_1 = arith.constant 0 : i32
    return %c0_i32, %c0_i32_0 : i32, i32
  }
  func.func @transform_5(%arg0: i32) -> (i32, i32) {
    %c0_i32 = arith.constant 0 : i32
    %c0_i32_0 = arith.constant 0 : i32
    %c0_i32_1 = arith.constant 0 : i32
    return %c0_i32, %c0_i32_0 : i32, i32
  }
  func.func @transform_6(%arg0: i32) -> (i32, i32) {
    %c0_i32 = arith.constant 0 : i32
    %c0_i32_0 = arith.constant 0 : i32
    %c0_i32_1 = arith.constant 0 : i32
    return %c0_i32, %c0_i32_0 : i32, i32
  }
  func.func @transform_7(%arg0: i32) -> (i32, i32) {
    %c0_i32 = arith.constant 0 : i32
    %c0_i32_0 = arith.constant 0 : i32
    %c0_i32_1 = arith.constant 0 : i32
    return %c0_i32, %c0_i32_0 : i32, i32
  }
  func.func @transform_8(%arg0: i32) -> (i32, i32) {
    %c0_i32 = arith.constant 0 : i32
    %c0_i32_0 = arith.constant 0 : i32
    %c0_i32_1 = arith.constant 0 : i32
    return %c0_i32, %c0_i32_0 : i32, i32
  }
  func.func @transform_9(%arg0: i32) -> (i32, i32) {
    %c0_i32 = arith.constant 0 : i32
    %c0_i32_0 = arith.constant 0 : i32
    %c0_i32_1 = arith.constant 0 : i32
    return %c0_i32, %c0_i32_0 : i32, i32
  }
  func.func @transform_10(%arg0: i32) -> (i32, i32) {
    %c0_i32 = arith.constant 0 : i32
    %c0_i32_0 = arith.constant 0 : i32
    %c0_i32_1 = arith.constant 0 : i32
    return %c0_i32, %c0_i32_0 : i32, i32
  }
  func.func @transform_11(%arg0: i32) -> (i32, i32) {
    %c0_i32 = arith.constant 0 : i32
    %c0_i32_0 = arith.constant 0 : i32
    %c0_i32_1 = arith.constant 0 : i32
    return %c0_i32, %c0_i32_0 : i32, i32
  }
  func.func @transform_12(%arg0: i32) -> (i32, i32) {
    %c0_i32 = arith.constant 0 : i32
    %c0_i32_0 = arith.constant 0 : i32
    %c0_i32_1 = arith.constant 0 : i32
    return %c0_i32, %c0_i32_0 : i32, i32
  }
  func.func @transform_13(%arg0: i32) -> (i32, i32) {
    %c0_i32 = arith.constant 0 : i32
    %c0_i32_0 = arith.constant 0 : i32
    %c0_i32_1 = arith.constant 0 : i32
    return %c0_i32, %c0_i32_0 : i32, i32
  }
  func.func @transform_14(%arg0: i32) -> (i32, i32) {
    %c0_i32 = arith.constant 0 : i32
    %c0_i32_0 = arith.constant 0 : i32
    return %arg0, %c0_i32 : i32, i32
  }
  func.func @transform_15(%arg0: i32) -> (i32, i32) {
    %c0_i32 = arith.constant 0 : i32
    %c0_i32_0 = arith.constant 0 : i32
    return %arg0, %c0_i32 : i32, i32
  }
}

</mosaic_0001>

<bundles_post_ra>
// kernel: tpu_custom_call.1
= control target key start
LH: loop header
LB: loop body
LE: loop exit
PB: predicated region body
PF: predicated region fallthrough
CT: control target
= control target key end

     0   :  { %21 = vsyncpa [#allocation3], 0  ;;  %s4713_s0 = inlined_call_operand.vmem [shape: f32[128,256], index: 0, kind: input, shape index: {}]   ;;  %s4714_s1 = inlined_call_operand.hbm [shape: f32[128,128], index: 1, kind: input, shape index: {}]   ;;  %s4715_s2 = inlined_call_operand.vmem [shape: f32[128,32], index: 2, kind: input, shape index: {}]   ;;  %s4716_s3 = inlined_call_operand.hbm [shape: bf16[256,128], index: 3, kind: input, shape index: {}]   ;;  %s4717_s4 = inlined_call_operand.vmem [shape: bf16[128,64], index: 4, kind: input, shape index: {}]   ;;  %s4718_s5 = inlined_call_operand.hbm [shape: f32[1,64], index: 5, kind: input, shape index: {}]   ;;  %s4719_s6 = inlined_call_operand.hbm [shape: bf16[64,64], index: 6, kind: input, shape index: {}]   ;;  %s4720_s7 = inlined_call_operand.hbm [shape: f32[1,64], index: 7, kind: input, shape index: {}]   ;;  %s4721_s8 = inlined_call_operand.hbm [shape: bf16[64,64], index: 8, kind: input, shape index: {}]   ;;  %s4722_s9 = inlined_call_operand.hbm [shape: f32[1,64], index: 9, kind: input, shape index: {}]   ;;  %s4723_s10 = inlined_call_operand.vmem [shape: bf16[32,128], index: 10, kind: input, shape index: {}]   ;;  %s4724_s11 = inlined_call_operand.hbm [shape: f32[1,128], index: 11, kind: input, shape index: {}]   ;;  %s4725_s12 = inlined_call_operand.hbm [shape: bf16[32,256], index: 12, kind: input, shape index: {}]   ;;  %s4726_s13 = inlined_call_operand.vmem [shape: f32[1,256], index: 13, kind: input, shape index: {}]   ;;  %s4727_s14 = inlined_call_operand.hbm [shape: f32[128,128], index: 14, kind: output, shape index: {0}]   ;;  %s4728_s15 = inlined_call_operand.hbm [shape: f32[128,256], index: 15, kind: output, shape index: {1}]  }
   0x1   :  { %22 = vsyncpa [#allocation6], 0 }
   0x2   :  { %23 = vsyncpa [#allocation9], 0 }
   0x3   :  { %24 = vsyncpa [#allocation12], 0 }
   0x4   :  { %25 = vsyncpa [#allocation15], 0 }
   0x5   :  { %26 = vsyncpa [#allocation4], 0 }
   0x6   :  { %27 = vsyncpa [#allocation19], 0  ;;  %s3553_s18 = smov [#allocation5]  }
   0x7   :  { %s49_s19 = sshll.u32 %s3553_s18, 4  ;;  %s50_s19 = int_to_ptr.vmem [resolvable:$true] %s49_s19 }
   0x8   :  { %s3327_s20 = scalar_lea.vmem %s50_s19, 2048  ;;  %p3332_p1 = scmp.lt.s32.totalorder %s50_s19, %s50_s19 }
   0x9   :  { %p3328_p0 = scmp.ne.s32.totalorder %s50_s19, %s3327_s20  ;;  %p3333_p2 = scmp.lt.s32.totalorder %s3327_s20, %s3327_s20 }
   0xb   :  { %p3334_p3 = por %p3333_p2, %p3332_p1 }
   0xd   :  { %p3335_p4 = pnand %p3334_p3, %p3328_p0 }
   0xf   :  { %3338 = shalt.err (!%p3335_p4)
}
  0x10   :  { %s3554_s21 = smov 64   ;;  %s3555_s22 = smov 4  }
  0x11   :  { %55 = dma.hbm_to_vmem [thread:$0]  %s4716_s3, 2048, %s50_s19, [#allocation6], %s3554_s21, %s3554_s21, %s3555_s22  }
  0x12   :  { %s3556_s25 = smov [#allocation8]   ;;  %s3557_s27 = smov [#allocation11]  }
  0x13   :  { %s73_s26 = sshll.u32 %s3556_s25, 4  ;;  %s95_s28 = sshll.u32 %s3557_s27, 4  ;;  %s74_s26 = int_to_ptr.vmem [resolvable:$true] %s73_s26  ;;  %s96_s28 = int_to_ptr.vmem [resolvable:$true] %s95_s28 }
  0x14   :  { %s3347_s29 = scalar_lea.vmem %s74_s26, 512  ;;  %p3352_p6 = scmp.lt.s32.totalorder %s74_s26, %s74_s26 }
  0x15   :  { %p3348_p5 = scmp.ne.s32.totalorder %s74_s26, %s3347_s29  ;;  %p3353_p7 = scmp.lt.s32.totalorder %s3347_s29, %s3347_s29 }
  0x17   :  { %p3354_p8 = por %p3353_p7, %p3352_p6 }
  0x19   :  { %p3355_p9 = pnand %p3354_p8, %p3348_p5 }
  0x1b   :  { %3358 = shalt.err (!%p3355_p9)
}
  0x1c   :  { %79 = dma.hbm_to_vmem [thread:$0]  %s4719_s6, 512, %s74_s26, [#allocation9], %s3554_s21, %s3554_s21, %s3555_s22  }
  0x1d   :  { %s3367_s3 = scalar_lea.vmem %s96_s28, 512  ;;  %p3372_p11 = scmp.lt.s32.totalorder %s96_s28, %s96_s28 }
  0x1e   :  { %p3368_p10 = scmp.ne.s32.totalorder %s96_s28, %s3367_s3  ;;  %p3373_p12 = scmp.lt.s32.totalorder %s3367_s3, %s3367_s3 }
  0x20   :  { %p3374_p13 = por %p3373_p12, %p3372_p11 }
  0x22   :  { %p3375_p0 = pnand %p3374_p13, %p3368_p10 }
  0x24   :  { %3378 = shalt.err (!%p3375_p0)
}
  0x25   :  { %101 = dma.hbm_to_vmem [thread:$0]  %s4721_s8, 512, %s96_s28, [#allocation12], %s3554_s21, %s3554_s21, %s3555_s22  }
  0x26   :  { %s3558_s19 = smov [#allocation14]   ;;  %s3559_s23 = smov [#allocation2]  }
  0x27   :  { %s120_s20 = sshll.u32 %s3558_s19, 4  ;;  %s35_s24 = sshll.u32 %s3559_s23, 4  ;;  %s121_s20 = int_to_ptr.vmem [resolvable:$true] %s120_s20  ;;  %s36_s24 = int_to_ptr.vmem [resolvable:$true] %s35_s24 }
  0x28   :  { %s3387_s6 = scalar_lea.vmem %s121_s20, 16  ;;  %s3391_s25 = scalar_lea.vmem %s121_s20, 32 }
  0x29   :  { %p3388_p1 = scmp.ne.s32.totalorder %s121_s20, %s3387_s6  ;;  %p3392_p2 = scmp.lt.s32.totalorder %s121_s20, %s121_s20 }
  0x2a   :  { %p3393_p3 = scmp.lt.s32.totalorder %s3391_s25, %s3387_s6 }
  0x2c   :  { %p3394_p4 = por %p3393_p3, %p3392_p2 }
  0x2e   :  { %p3395_p5 = pnand %p3394_p4, %p3388_p1 }
  0x30   :  { %3398 = shalt.err (!%p3395_p5)
}
  0x31   :  { %123 = dma.hbm_to_vmem [thread:$0]  %s4724_s11, 16, %s121_s20, [#allocation15]  }
  0x32   :  { %s3407_s29 = scalar_lea.vmem %s36_s24, 2048  ;;  %p3412_p7 = scmp.lt.s32.totalorder %s36_s24, %s36_s24 }
  0x33   :  { %p3408_p6 = scmp.ne.s32.totalorder %s36_s24, %s3407_s29  ;;  %p3413_p8 = scmp.lt.s32.totalorder %s3407_s29, %s3407_s29 }
  0x35   :  { %p3414_p9 = por %p3413_p8, %p3412_p7 }
  0x37   :  { %p3415_p10 = pnand %p3414_p9, %p3408_p6 }
  0x39   :  { %3418 = shalt.err (!%p3415_p10)
}
  0x3a   :  { %s3560_s8 = smov 128   ;;  %s3561_s22 = smov 8  }
  0x3b   :  { %41 = dma.hbm_to_vmem [thread:$0]  %s4714_s1, 2048, %s36_s24, [#allocation3], %s3560_s8, %s3560_s8, %s3561_s22  }
  0x3c   :  { %s3562_s16 = smov [#allocation7]   ;;  %s3563_s11 = smov [#allocation10]  }
  0x3d   :  { %s64_s3 = sshll.u32 %s3562_s16, 4  ;;  %s86_s17 = sshll.u32 %s3563_s11, 4  ;;  %s65_s3 = int_to_ptr.vmem [resolvable:$true] %s64_s3  ;;  %s87_s17 = int_to_ptr.vmem [resolvable:$true] %s86_s17 }
  0x3e   :  { %s3427_s18 = scalar_lea.vmem %s65_s3, 16  ;;  %s3431_s19 = scalar_lea.vmem %s65_s3, 32 }
  0x3f   :  { %p3428_p11 = scmp.ne.s32.totalorder %s65_s3, %s3427_s18  ;;  %p3432_p12 = scmp.lt.s32.totalorder %s65_s3, %s65_s3 }
  0x40   :  { %p3433_p13 = scmp.lt.s32.totalorder %s3431_s19, %s3427_s18 }
  0x42   :  { %p3434_p0 = por %p3433_p13, %p3432_p12 }
  0x44   :  { %p3435_p1 = pnand %p3434_p0, %p3428_p11 }
  0x46   :  { %3438 = shalt.err (!%p3435_p1)
}
  0x47   :  { %67 = dma.hbm_to_vmem [thread:$0]  %s4718_s5, 16, %s65_s3, [#allocation6]  }
  0x48   :  { %s3447_s6 = scalar_lea.vmem %s87_s17, 16  ;;  %s3451_s1 = scalar_lea.vmem %s87_s17, 32 }
  0x49   :  { %p3448_p2 = scmp.ne.s32.totalorder %s87_s17, %s3447_s6  ;;  %p3452_p3 = scmp.lt.s32.totalorder %s87_s17, %s87_s17 }
  0x4a   :  { %p3453_p4 = scmp.lt.s32.totalorder %s3451_s1, %s3447_s6 }
  0x4c   :  { %p3454_p5 = por %p3453_p4, %p3452_p3 }
  0x4e   :  { %p3455_p6 = pnand %p3454_p5, %p3448_p2 }
  0x50   :  { %3458 = shalt.err (!%p3455_p6)
}
  0x51   :  { %89 = dma.hbm_to_vmem [thread:$0]  %s4720_s7, 16, %s87_s17, [#allocation9]  }
  0x52   :  { %s3564_s26 = smov [#allocation13]   ;;  %s3565_s29 = smov [#allocation16]  }
  0x53   :  { %s108_s27 = sshll.u32 %s3564_s26, 4  ;;  %s129_s28 = sshll.u32 %s3565_s29, 4  ;;  %s109_s27 = int_to_ptr.vmem [resolvable:$true] %s108_s27  ;;  %s130_s28 = int_to_ptr.vmem [resolvable:$true] %s129_s28 }
  0x54   :  { %s3467_s30 = scalar_lea.vmem %s109_s27, 16  ;;  %s3471_s5 = scalar_lea.vmem %s109_s27, 32 }
  0x55   :  { %p3468_p7 = scmp.ne.s32.totalorder %s109_s27, %s3467_s30  ;;  %p3472_p8 = scmp.lt.s32.totalorder %s109_s27, %s109_s27 }
  0x56   :  { %p3473_p9 = scmp.lt.s32.totalorder %s3471_s5, %s3467_s30 }
  0x58   :  { %p3474_p10 = por %p3473_p9, %p3472_p8 }
  0x5a   :  { %p3475_p11 = pnand %p3474_p10, %p3468_p7 }
  0x5c   :  { %3478 = shalt.err (!%p3475_p11)
}
  0x5d   :  { %111 = dma.hbm_to_vmem [thread:$0]  %s4722_s9, 16, %s109_s27, [#allocation12]  }
  0x5e   :  { %s3487_s11 = scalar_lea.vmem %s130_s28, 512  ;;  %p3492_p13 = scmp.lt.s32.totalorder %s130_s28, %s130_s28 }
  0x5f   :  { %p3488_p12 = scmp.ne.s32.totalorder %s130_s28, %s3487_s11  ;;  %p3493_p0 = scmp.lt.s32.totalorder %s3487_s11, %s3487_s11 }
  0x61   :  { %p3494_p1 = por %p3493_p0, %p3492_p13 }
  0x63   :  { %p3495_p2 = pnand %p3494_p1, %p3488_p12 }
  0x65   :  { %3498 = shalt.err (!%p3495_p2)
}
  0x66   :  { %135 = dma.hbm_to_vmem [thread:$0]  %s4725_s12, 512, %s130_s28, [#allocation15], %s3560_s8, %s3560_s8, %s3561_s22  }
  0x67   :  { %3539 = dma.done.wait [#allocation3], 2048  }
  0x68   :  { %3540 = vsyncadd [#allocation3], 4294965248 }
  0x69   :  { %3541 = dma.done.wait [#allocation6], 2064  }
  0x6a   :  { %3542 = vsyncadd [#allocation6], 4294965232 }
  0x6b   :  { %3543 = dma.done.wait [#allocation9], 528  }
  0x6c   :  { %3544 = vsyncadd [#allocation9], 4294966768 }
  0x6d   :  { %3545 = dma.done.wait [#allocation12], 528  }
  0x6e   :  { %3546 = vsyncadd [#allocation12], 4294966768 }
  0x6f   :  { %3547 = dma.done.wait [#allocation15], 528  }
  0x70   :  { %3548 = vsyncadd [#allocation15], 4294966768  ;;  %v3023_v0 = vld [vmem:[#allocation5 + $0x78] sm:$0xff]   ;;  %v3025_v2 = vld [vmem:[#allocation5 + $0x70] sm:$0xff]   ;;  %vm726_vm0 = vcmask 523264   ;;  %s3567_s11 = smov 32  }
  0x71   :  { %v3024_v1 = vld [vmem:[#allocation5 + $0x38] sm:$0xff]   ;;  %2683 = vmatprep.subr.bf16.mxu0 %v3023_v0  ;;  %v3026_v3 = vld [vmem:[#allocation5 + $0x30] sm:$0xff]   ;;  %v3027_v4 = vld [vmem:[#allocation5 + $0x68] sm:$0xff]   ;;  %vm1303_vm1 = vcmask 261120  }
  0x72   :  { %2684 = vmatpush3.bf16.msra.mxu0 %v3024_v1  ;;  %v3028_v5 = vld [vmem:[#allocation5 + $0x28] sm:$0xff]   ;;  %v3029_v6 = vld [vmem:[#allocation5 + $0x60] sm:$0xff]   ;;  %v3031_v8 = vld [vmem:[#allocation5 + $0x58] sm:$0xff]  }
  0x73   :  { %2685 = vmatprep.subr.bf16.mxu0 %v3025_v2  ;;  %v3030_v7 = vld [vmem:[#allocation5 + $0x20] sm:$0xff]   ;;  %v3032_v9 = vld [vmem:[#allocation5 + $0x18] sm:$0xff]   ;;  %v3033_v10 = vld [vmem:[#allocation5 + $0x50] sm:$0xff]  }
  0x74   :  { %v167_v11 = vld [vmem:[%s4713_s0 + $0x8] sm:$0xff]  ;;  %v169_v12 = vld [vmem:[%s4713_s0 + $0x18] sm:$0xff]  ;;  %v3034_v15 = vld [vmem:[#allocation5 + $0x10] sm:$0xff]  }
  0x75   :  { %v247_v13 = vpack.c.bf16 %v169_v12, %v167_v11  ;;  %v3039_v14 = vld [vmem:[%s4717_s4 + $0x38] sm:$0xff]   ;;  %v3040_v16 = vld [vmem:[%s4717_s4 + $0x30] sm:$0xff]   ;;  %v3035_v17 = vld [vmem:[#allocation5 + $0x48] sm:$0xff]  }
  0x76   :  { %2686 = vmatpush3.bf16.msra.mxu0 %v3026_v3  ;;  %2987 = vmatprep.subr.bf16.mxu1 %v3039_v14  ;;  %v3041_v18 = vld [vmem:[%s4717_s4 + $0x28] sm:$0xff]   ;;  %v3037_v20 = vld [vmem:[#allocation5 + $0x40] sm:$0xff]   ;;  %v168_v23 = vld [vmem:[%s4713_s0 + $0x10] sm:$0xff] }
  0x77   :  { %2687 = vmatprep.subr.bf16.mxu0 %v3027_v4  ;;  %390 = vmatprep.mubr.bf16.mxu0 %v247_v13  ;;  %v3036_v19 = vld [vmem:[#allocation5 + $0x8] sm:$0xff]   ;;  %v3038_v21 = vld [vmem:[#allocation5] sm:$0xff]   ;;  %v173_v26 = vld [vmem:[%s4713_s0 + $0x38] sm:$0xff] }
  0x78   :  { %2995 = vmatpush3.bf16.msra.mxu1 %v3039_v14  ;;  %v166_v22 = vld [vmem:[%s4713_s0] sm:$0xff]  ;;  %v171_v25 = vld [vmem:[%s4713_s0 + $0x28] sm:$0xff]  ;;  %v3043_v28 = vld [vmem:[%s4717_s4 + $0x18] sm:$0xff]  }
  0x79   :  { %2988 = vmatprep.subr.bf16.mxu1 %v3040_v16  ;;  %v3042_v24 = vld [vmem:[%s4717_s4 + $0x20] sm:$0xff]   ;;  %v246_v27 = vpack.c.bf16 %v168_v23, %v166_v22  ;;  %v249_v30 = vpack.c.bf16 %v173_v26, %v171_v25  ;;  %v207_v31 = vld [vmem:[#allocation2 + $0x48] sm:$0xff]  ;;  %v3044_v33 = vld [vmem:[%s4717_s4 + $0x10] sm:$0xff]  }
  0x7a   :  { %2688 = vmatpush3.bf16.msra.mxu0 %v3028_v5  ;;  %v206_v29 = vld [vmem:[#allocation2 + $0x40] sm:$0xff]  ;;  %v172_v35 = vld [vmem:[%s4713_s0 + $0x30] sm:$0xff]  ;;  %v175_v36 = vld [vmem:[%s4713_s0 + $0x48] sm:$0xff] }
  0x7b   :  { %2689 = vmatprep.subr.bf16.mxu0 %v3029_v6  ;;  %v475_v32 = vpack.c.bf16 %v207_v31, %v206_v29  ;;  %v170_v34 = vld [vmem:[%s4713_s0 + $0x20] sm:$0xff]  ;;  %v177_v37 = vld [vmem:[%s4713_s0 + $0x58] sm:$0xff]  ;;  %v3045_v39 = vld [vmem:[%s4717_s4 + $0x8] sm:$0xff]  }
  0x7c   :  { %2996 = vmatpush3.bf16.msra.mxu1 %v3040_v16  ;;  %v248_v38 = vpack.c.bf16 %v172_v35, %v170_v34  ;;  %v251_v40 = vpack.c.bf16 %v177_v37, %v175_v36  ;;  %v3046_v41 = vld [vmem:[%s4717_s4] sm:$0xff]   ;;  %v176_v43 = vld [vmem:[%s4713_s0 + $0x50] sm:$0xff]  ;;  %v179_v44 = vld [vmem:[%s4713_s0 + $0x68] sm:$0xff] }
  0x7d   :  { %2989 = vmatprep.subr.bf16.mxu1 %v3041_v18  ;;  %2851 = vmatprep.mubr.bf16.mxu1 %v475_v32  ;;  %v174_v42 = vld [vmem:[%s4713_s0 + $0x40] sm:$0xff]  ;;  %v181_v45 = vld [vmem:[%s4713_s0 + $0x78] sm:$0xff]  ;;  %v208_v46 = vld [vmem:[#allocation2 + $0x50] sm:$0xff] }
  0x7e   :  { %2690 = vmatpush3.bf16.msra.mxu0 %v3030_v7  ;;  %v209_v47 = vld [vmem:[#allocation2 + $0x58] sm:$0xff]  ;;  %v210_v48 = vld [vmem:[#allocation2 + $0x60] sm:$0xff]  ;;  %v211_v49 = vld [vmem:[#allocation2 + $0x68] sm:$0xff]  ;;  %v250_v50 = vpack.c.bf16 %v176_v43, %v174_v42  ;;  %v253_v51 = vpack.c.bf16 %v181_v45, %v179_v44 }
  0x7f   :  { %2691 = vmatprep.subr.bf16.mxu0 %v3031_v8  ;;  %v476_v52 = vpack.c.bf16 %v209_v47, %v208_v46  ;;  %v477_v53 = vpack.c.bf16 %v211_v49, %v210_v48  ;;  %v178_v54 = vld [vmem:[%s4713_s0 + $0x60] sm:$0xff]  ;;  %v180_v55 = vld [vmem:[%s4713_s0 + $0x70] sm:$0xff]  ;;  %v183_v56 = vld [vmem:[%s4713_s0 + $0x88] sm:$0xff] }
  0x80   :  { %2997 = vmatpush3.bf16.msra.mxu1 %v3041_v18  ;;  %v185_v57 = vld [vmem:[%s4713_s0 + $0x98] sm:$0xff]  ;;  %v212_v58 = vld [vmem:[#allocation2 + $0x70] sm:$0xff]  ;;  %v252_v60 = vpack.c.bf16 %v180_v55, %v178_v54  ;;  %v182_v63 = vld [vmem:[%s4713_s0 + $0x80] sm:$0xff] }
  0x81   :  { %2990 = vmatprep.subr.bf16.mxu1 %v3042_v24  ;;  %v213_v59 = vld [vmem:[#allocation2 + $0x78] sm:$0xff]  ;;  %v255_v61 = vpack.c.bf16 %v185_v57, %v183_v56  ;;  %v184_v0 = vld [vmem:[%s4713_s0 + $0x90] sm:$0xff]  ;;  %v187_v1 = vld [vmem:[%s4713_s0 + $0xa8] sm:$0xff] }
  0x82   :  { %2692 = vmatpush3.bf16.msra.mxu0 %v3032_v9  ;;  %v478_v62 = vpack.c.bf16 %v213_v59, %v212_v58  ;;  %v189_v2 = vld [vmem:[%s4713_s0 + $0xb8] sm:$0xff]  ;;  %v254_v3 = vpack.c.bf16 %v184_v0, %v182_v63  ;;  %v186_v5 = vld [vmem:[%s4713_s0 + $0xa0] sm:$0xff]  ;;  %v188_v6 = vld [vmem:[%s4713_s0 + $0xb0] sm:$0xff] }
  0x83   :  { %2693 = vmatprep.subr.bf16.mxu0 %v3033_v10  ;;  %v257_v4 = vpack.c.bf16 %v189_v2, %v187_v1  ;;  %v191_v7 = vld [vmem:[%s4713_s0 + $0xc8] sm:$0xff]  ;;  %v193_v8 = vld [vmem:[%s4713_s0 + $0xd8] sm:$0xff]  ;;  %v256_v9 = vpack.c.bf16 %v188_v6, %v186_v5  ;;  %v190_v11 = vld [vmem:[%s4713_s0 + $0xc0] sm:$0xff] }
  0x84   :  { %2998 = vmatpush3.bf16.msra.mxu1 %v3042_v24  ;;  %v259_v10 = vpack.c.bf16 %v193_v8, %v191_v7  ;;  %v192_v12 = vld [vmem:[%s4713_s0 + $0xd0] sm:$0xff]  ;;  %v195_v13 = vld [vmem:[%s4713_s0 + $0xe8] sm:$0xff]  ;;  %v202_v25 = vld [vmem:[#allocation2 + $0x20] sm:$0xff] }
  0x85   :  { %2991 = vmatprep.subr.bf16.mxu1 %v3043_v28  ;;  %v200_v23 = vld [vmem:[#allocation2 + $0x10] sm:$0xff]  ;;  %v203_v26 = vld [vmem:[#allocation2 + $0x28] sm:$0xff]  ;;  %v3047_v32 = vld [vmem:[#allocation8 + $0x18] sm:$0xff]  }
  0x86   :  { %2694 = vmatpush3.bf16.msra.mxu0 %v3034_v15  ;;  %v258_v15 = vpack.c.bf16 %v192_v12, %v190_v11  ;;  %v204_v29 = vld [vmem:[#allocation2 + $0x30] sm:$0xff]  ;;  %v3050_v35 = vld [vmem:[#allocation8] sm:$0xff]  }
  0x87   :  { %2695 = vmatprep.subr.bf16.mxu0 %v3035_v17  ;;  %v194_v17 = vld [vmem:[%s4713_s0 + $0xe0] sm:$0xff]  ;;  %v3049_v34 = vld [vmem:[#allocation8 + $0x8] sm:$0xff]  }
  0x88   :  { %2999 = vmatpush3.bf16.msra.mxu1 %v3043_v28 }
  0x89   :  { %2992 = vmatprep.subr.bf16.mxu1 %v3044_v33 }
  0x8a   :  { %2696 = vmatpush3.bf16.msra.mxu0 %v3036_v19  ;;  %v198_v19 = vld [vmem:[#allocation2] sm:$0xff] }
  0x8b   :  { %2697 = vmatprep.subr.bf16.mxu0 %v3037_v20  ;;  %v199_v20 = vld [vmem:[#allocation2 + $0x8] sm:$0xff] }
  0x8c   :  { %3000 = vmatpush3.bf16.msra.mxu1 %v3044_v33  ;;  %v471_v22 = vpack.c.bf16 %v199_v20, %v198_v19 }
  0x8d   :  { %2993 = vmatprep.subr.bf16.mxu1 %v3045_v39 }
  0x8e   :  { %2698 = vmatpush3.bf16.msra.mxu0 %v3038_v21 }
  0x8f   :  { %2827 = vmatprep.subr.bf16.mxu0 %v3039_v14 }
  0x90   :  { %3001 = vmatpush3.bf16.msra.mxu1 %v3045_v39 }
  0x91   :  { %391 = vmatmul.mubr.bf16.vlgmr.msra.gmra.mxu0 %v246_v27  ;;  %2994 = vmatprep.subr.bf16.mxu1 %v3046_v41 }
  0x92   :  { %2828 = vmatpush3.bf16.msra.mxu0 %v3039_v14  ;;  %398 = vmatprep.mubr.bf16.mxu0 %v249_v30  ;;  %v197_v14 = vld [vmem:[%s4713_s0 + $0xf8] sm:$0xff] }
  0x93   :  { %2829 = vmatprep.subr.bf16.mxu0 %v3040_v16  ;;  %v205_v30 = vld [vmem:[#allocation2 + $0x38] sm:$0xff] }
  0x94   :  { %3002 = vmatpush3.bf16.msra.mxu1 %v3046_v41  ;;  %v474_v31 = vpack.c.bf16 %v205_v30, %v204_v29 }
  0x95   :  { %2859 = vmatprep.subr.bf16.mxu1 %v3047_v32 }
  0x96   :  { %2830 = vmatpush3.bf16.msra.mxu0 %v3040_v16  ;;  %v261_v16 = vpack.c.bf16 %v197_v14, %v195_v13 }
  0x97   :  { %2831 = vmatprep.subr.bf16.mxu0 %v3041_v18  ;;  %2852 = vmatmul.mubr.bf16.vlgmr.msra.gmra.mxu1 %v476_v52 }
  0x98   :  { %2855 = vmatprep.mubr.bf16.mxu1 %v477_v53  ;;  %2860 = vmatpush3.bf16.msra.mxu1 %v3047_v32 }
  0x99   :  { %399 = vmatmul.mubr.bf16.gmra.mxu0 %v248_v38 }
  0x9a   :  { %406 = vmatprep.mubr.bf16.mxu0 %v251_v40  ;;  %2832 = vmatpush3.bf16.msra.mxu0 %v3041_v18  ;;  %v196_v18 = vld [vmem:[%s4713_s0 + $0xf0] sm:$0xff] }
  0x9b   :  { %2833 = vmatprep.subr.bf16.mxu0 %v3042_v24  ;;  %v260_v21 = vpack.c.bf16 %v196_v18, %v194_v17 }
  0x9e   :  { %2834 = vmatpush3.bf16.msra.mxu0 %v3042_v24  ;;  %v201_v24 = vld [vmem:[#allocation2 + $0x18] sm:$0xff] }
  0x9f   :  { %2835 = vmatprep.subr.bf16.mxu0 %v3043_v28  ;;  %2856 = vmatmul.mubr.bf16.gmra.mxu1 %v478_v62  ;;  %v472_v27 = vpack.c.bf16 %v201_v24, %v200_v23 }
  0xa1   :  { %407 = vmatmul.mubr.bf16.gmra.mxu0 %v250_v50 }
  0xa2   :  { %414 = vmatprep.mubr.bf16.mxu0 %v253_v51  ;;  %2836 = vmatpush3.bf16.msra.mxu0 %v3043_v28  ;;  %v473_v28 = vpack.c.bf16 %v203_v26, %v202_v25 }
  0xa3   :  { %2837 = vmatprep.subr.bf16.mxu0 %v3044_v33 }
  0xa6   :  { %2838 = vmatpush3.bf16.msra.mxu0 %v3044_v33  ;;  %v3048_v33 = vld [vmem:[#allocation8 + $0x10] sm:$0xff]  }
  0xa7   :  { %2839 = vmatprep.subr.bf16.mxu0 %v3045_v39  ;;  %2861 = vmatprep.subr.bf16.mxu1 %v3048_v33 }
  0xa8   :  { %2862 = vmatpush3.bf16.msra.mxu1 %v3048_v33 }
  0xa9   :  { %415 = vmatmul.mubr.bf16.gmra.mxu0 %v252_v60  ;;  %2863 = vmatprep.subr.bf16.mxu1 %v3049_v34 }
  0xaa   :  { %422 = vmatprep.mubr.bf16.mxu0 %v255_v61  ;;  %2840 = vmatpush3.bf16.msra.mxu0 %v3045_v39 }
  0xab   :  { %2841 = vmatprep.subr.bf16.mxu0 %v3046_v41 }
  0xac   :  { %2864 = vmatpush3.bf16.msra.mxu1 %v3049_v34 }
  0xad   :  { %2865 = vmatprep.subr.bf16.mxu1 %v3050_v35 }
  0xae   :  { %2842 = vmatpush3.bf16.msra.mxu0 %v3046_v41 }
  0xb0   :  { %2866 = vmatpush3.bf16.msra.mxu1 %v3050_v35 }
  0xb1   :  { %423 = vmatmul.mubr.bf16.gmra.mxu0 %v254_v3 }
  0xb2   :  { %430 = vmatprep.mubr.bf16.mxu0 %v257_v4 }
  0xb9   :  { %431 = vmatmul.mubr.bf16.gmra.mxu0 %v256_v9 }
  0xba   :  { %438 = vmatprep.mubr.bf16.mxu0 %v259_v10 }
  0xc1   :  { %439 = vmatmul.mubr.bf16.gmra.mxu0 %v258_v15 }
  0xc2   :  { %446 = vmatprep.mubr.bf16.mxu0 %v261_v16 }
  0xc9   :  { %447 = vmatmul.mubr.bf16.gmra.mxu0 %v260_v21 }
  0xca   :  { %2843 = vmatprep.mubr.bf16.mxu0 %v471_v22 }
  0xd1   :  { %2844 = vmatmul.mubr.bf16.vlgmr.msra.gmra.mxu0 %v472_v27 }
  0xd2   :  { %2847 = vmatprep.mubr.bf16.mxu0 %v473_v28 }
  0xd9   :  { %2848 = vmatmul.mubr.bf16.gmra.mxu0 %v474_v31  ;;  %v3866_v31 = vld [vmem:[#allocation7] ss:$0 sm:$0xff] }
 0x151   :  { %v2699_v36 = vpop.f32.mrf.mxu0 }
 0x153   :  { %v2700_v37 = vpop.f32.mrf.mxu0 }
 0x154   :  { %v3812_v38 = vadd.f32 %v2700_v37, %v2699_v36 }
 0x155   :  { %v2702_v39 = vpop.f32.mrf.mxu0 }
 0x156   :  { %880 = vrot.lane.b32.xlu0 %v3812_v38, %s3554_s21 }
 0x157   :  { %v2703_v40 = vpop.f32.mrf.mxu0  ;;  %v3852_v12 = vpop.f32.mrf.mxu1 }
 0x158   :  { %v3816_v41 = vadd.f32 %v2703_v40, %v2702_v39 }
 0x159   :  { %v2705_v42 = vpop.f32.mrf.mxu0  ;;  %v593_v16 = vpop.f32.mrf.mxu1 }
 0x15a   :  { %882 = vrot.lane.b32.xlu0 %v3816_v41, %s3554_s21 }
 0x15b   :  { %v2706_v43 = vpop.f32.mrf.mxu0  ;;  %v2854_v20 = vpop.f32.mrf.mxu1 }
 0x15c   :  { %v2707_v44 = vadd.f32 %v2706_v43, %v2705_v42 }
 0x15d   :  { %v2708_v45 = vpop.f32.mrf.mxu0  ;;  %v596_v24 = vpop.f32.mrf.mxu1 }
 0x15e   :  { %884 = vrot.lane.b32.xlu1 %v2707_v44, %s3554_s21 }
 0x15f   :  { %v2709_v46 = vpop.f32.mrf.mxu0  ;;  %v3864_v27 = vpop.f32.mrf.mxu1 }
 0x160   :  { %v2710_v47 = vadd.f32 %v2709_v46, %v2708_v45 }
 0x161   :  { %v2711_v48 = vpop.f32.mrf.mxu0  ;;  %v609_v36 = vpop.f32.mrf.mxu1 }
 0x162   :  { %886 = vrot.lane.b32.xlu1 %v2710_v47, %s3554_s21 }
 0x163   :  { %v2712_v49 = vpop.f32.mrf.mxu0 }
 0x164   :  { %v3822_v50 = vadd.f32 %v2712_v49, %v2711_v48 }
 0x165   :  { %v2714_v51 = vpop.f32.mrf.mxu0 }
 0x166   :  { %888 = vrot.lane.b32.xlu0 %v3822_v50, %s3554_s21 }
 0x167   :  { %v2715_v52 = vpop.f32.mrf.mxu0 }
 0x168   :  { %v3826_v53 = vadd.f32 %v2715_v52, %v2714_v51 }
 0x169   :  { %v2717_v54 = vpop.f32.mrf.mxu0 }
 0x16a   :  { %890 = vrot.lane.b32.xlu1 %v3826_v53, %s3554_s21 }
 0x16b   :  { %v2718_v55 = vpop.f32.mrf.mxu0 }
 0x16c   :  { %v3830_v56 = vadd.f32 %v2718_v55, %v2717_v54 }
 0x16d   :  { %v2720_v57 = vpop.f32.mrf.mxu0 }
 0x16e   :  { %892 = vrot.lane.b32.xlu0 %v3830_v56, %s3554_s21 }
 0x16f   :  { %v2721_v58 = vpop.f32.mrf.mxu0 }
 0x170   :  { %v3834_v59 = vadd.f32 %v2721_v58, %v2720_v57 }
 0x171   :  { %v2723_v60 = vpop.f32.mrf.mxu0 }
 0x172   :  { %894 = vrot.lane.b32.xlu1 %v3834_v59, %s3554_s21 }
 0x173   :  { %v2724_v61 = vpop.f32.mrf.mxu0 }
 0x174   :  { %v2725_v62 = vadd.f32 %v2724_v61, %v2723_v60 }
 0x175   :  { %v2726_v63 = vpop.f32.mrf.mxu0 }
 0x176   :  { %896 = vrot.lane.b32.xlu0 %v2725_v62, %s3554_s21 }
 0x177   :  { %v2727_v0 = vpop.f32.mrf.mxu0 }
 0x178   :  { %v2728_v1 = vadd.f32 %v2727_v0, %v2726_v63 }
 0x179   :  { %v2729_v2 = vpop.f32.mrf.mxu0 }
 0x17a   :  { %898 = vrot.lane.b32.xlu1 %v2728_v1, %s3554_s21  ;;  %v633_v43 = vadd.f32 %v2728_v1, %v596_v24 }
 0x17b   :  { %v2730_v3 = vpop.f32.mrf.mxu0 }
 0x17c   :  { %v3840_v4 = vadd.f32 %v2730_v3, %v2729_v2  ;;  %v656_v58 = vadd.f32 %v3866_v31, %v633_v43 }
 0x17d   :  { %v2732_v5 = vpop.f32.mrf.mxu0 }
 0x17e   :  { %900 = vrot.lane.b32.xlu0 %v3840_v4, %s3554_s21  ;;  %v672_v2 = vmax.f32 %v656_v58, 0.0 }
 0x17f   :  { %v2733_v6 = vpop.f32.mrf.mxu0 }
 0x180   :  { %v3844_v7 = vadd.f32 %v2733_v6, %v2732_v5 }
 0x181   :  { %v2735_v8 = vpop.f32.mrf.mxu0 }
 0x182   :  { %902 = vrot.lane.b32.xlu1 %v3844_v7, %s3554_s21  ;;  %v635_v0 = vadd.f32 %v2854_v20, %v3844_v7 }
 0x183   :  { %v2736_v9 = vpop.f32.mrf.mxu0 }
 0x184   :  { %v3848_v10 = vadd.f32 %v2736_v9, %v2735_v8 }
 0x185   :  { %v2738_v11 = vpop.f32.mrf.mxu0 }
 0x186   :  { %904 = vrot.lane.b32.xlu0 %v3848_v10, %s3554_s21 }
 0x187   :  { %v2739_v13 = vpop.f32.mrf.mxu0 }
 0x188   :  { %v2740_v14 = vadd.f32 %v2739_v13, %v2738_v11  ;;  %v636_v11 = vadd.f32 %v3848_v10, %v609_v36 }
 0x189   :  { %v2741_v15 = vpop.f32.mrf.mxu0 }
 0x18a   :  { %906 = vrot.lane.b32.xlu1 %v2740_v14, %s3554_s21 }
 0x18b   :  { %v2742_v17 = vpop.f32.mrf.mxu0 }
 0x18c   :  { %v3855_v18 = vadd.f32 %v2742_v17, %v2741_v15  ;;  %v658_v15 = vadd.f32 %v3866_v31, %v635_v0 }
 0x18d   :  { %v2744_v19 = vpop.f32.mrf.mxu0 }
 0x18e   :  { %908 = vrot.lane.b32.xlu0 %v3855_v18, %s3554_s21 }
 0x18f   :  { %v2745_v21 = vpop.f32.mrf.mxu0 }
 0x190   :  { %v3859_v22 = vadd.f32 %v2745_v21, %v2744_v19  ;;  %v638_v21 = vadd.f32 %v3864_v27, %v3855_v18  ;;  %v3052_v18 = vld [vmem:[#allocation11 + $0x10] sm:$0xff]   ;;  %v3053_v27 = vld [vmem:[#allocation11 + $0x8] sm:$0xff]  }
 0x191   :  { %v2845_v23 = vpop.f32.mrf.mxu0 }
 0x192   :  { %910 = vrot.lane.b32.xlu1 %v3859_v22, %s3554_s21  ;;  %v626_v28 = vadd.f32 %v2845_v23, %v2707_v44 }
 0x193   :  { %v561_v25 = vpop.f32.mrf.mxu0 }
 0x194   :  { %v624_v26 = vadd.f32 %v3812_v38, %v561_v25  ;;  %v649_v37 = vadd.f32 %v3866_v31, %v626_v28  ;;  %v661_v28 = vadd.f32 %v3866_v31, %v638_v21 }
 0x195   :  { %v2846_v29 = vpop.f32.mrf.mxu0 }
 0x196   :  { %v627_v30 = vadd.f32 %v2846_v29, %v2710_v47  ;;  %v647_v33 = vadd.f32 %v3866_v31, %v624_v26  ;;  %v2858_v47 = vpop.f32.mrf.mxu1  ;;  %v665_v48 = vmax.f32 %v649_v37, 0.0 }
 0x197   :  { %v564_v32 = vpop.f32.mrf.mxu0  ;;  %v639_v10 = vadd.f32 %v2858_v47, %v3859_v22  ;;  %v3051_v22 = vld [vmem:[#allocation11 + $0x18] sm:$0xff]  }
 0x198   :  { %v650_v34 = vadd.f32 %v3866_v31, %v627_v30  ;;  %v625_v35 = vadd.f32 %v3816_v41, %v564_v32  ;;  %v663_v44 = vmax.f32 %v647_v33, 0.0  ;;  %v632_v41 = vadd.f32 %v2725_v62, %v593_v16  ;;  %v612_v63 = vpop.f32.mrf.mxu1  ;;  %2883 = vmatprep.subr.bf16.mxu0 %v3051_v22  ;;  %v3054_v33 = vld [vmem:[#allocation11] sm:$0xff]  }
 0x199   :  { %v2849_v39 = vpop.f32.mrf.mxu0  ;;  %v637_v3 = vadd.f32 %v2740_v14, %v612_v63  ;;  %v659_v14 = vadd.f32 %v3866_v31, %v636_v11  ;;  %v662_v25 = vadd.f32 %v3866_v31, %v639_v10  ;;  %v677_v30 = vmax.f32 %v661_v28, 0.0  ;;  %2884 = vmatpush3.bf16.msra.mxu0 %v3051_v22 }
 0x19a   :  { %v648_v38 = vadd.f32 %v3866_v31, %v625_v35  ;;  %v666_v40 = vmax.f32 %v650_v34, 0.0  ;;  %v630_v49 = vadd.f32 %v2849_v39, %v3830_v56  ;;  %v655_v62 = vadd.f32 %v3866_v31, %v632_v41  ;;  %2885 = vmatprep.subr.bf16.mxu0 %v3052_v18  ;;  %v3904_v34 = vld [vmem:[#allocation10] ss:$0 sm:$0xff] }
 0x19b   :  { %v577_v42 = vpop.f32.mrf.mxu0  ;;  %v660_v19 = vadd.f32 %v3866_v31, %v637_v3  ;;  %v675_v23 = vmax.f32 %v659_v14, 0.0  ;;  %v678_v29 = vmax.f32 %v662_v25, 0.0 }
 0x19c   :  { %v664_v45 = vmax.f32 %v648_v38, 0.0  ;;  %v628_v46 = vadd.f32 %v3822_v50, %v577_v42  ;;  %v688_v55 = vpack.c.bf16 %v666_v40, %v665_v48  ;;  %v653_v56 = vadd.f32 %v3866_v31, %v630_v49 }
 0x19d   :  { %v2850_v51 = vpop.f32.mrf.mxu0  ;;  %v671_v9 = vmax.f32 %v655_v62, 0.0  ;;  %v694_v32 = vpack.c.bf16 %v678_v29, %v677_v30  ;;  %2886 = vmatpush3.bf16.msra.mxu0 %v3052_v18 }
 0x19e   :  { %v687_v52 = vpack.c.bf16 %v664_v45, %v663_v44  ;;  %v631_v54 = vadd.f32 %v2850_v51, %v3834_v59  ;;  %v651_v60 = vadd.f32 %v3866_v31, %v628_v46  ;;  %v669_v8 = vmax.f32 %v653_v56, 0.0  ;;  %2887 = vmatprep.subr.bf16.mxu0 %v3053_v27 }
 0x19f   :  { %v580_v57 = vpop.f32.mrf.mxu0  ;;  %v691_v17 = vpack.c.bf16 %v672_v2, %v671_v9 }
 0x1a0   :  { %v654_v61 = vadd.f32 %v3866_v31, %v631_v54  ;;  %v629_v50 = vadd.f32 %v3826_v53, %v580_v57  ;;  %2867 = vmatprep.mubr.msk.bf16.mxu1 %vm726_vm0, %v687_v52  ;;  %v667_v5 = vmax.f32 %v651_v60, 0.0  ;;  %v634_v53 = vadd.f32 %v3852_v12, %v3840_v4 }
 0x1a1   :  { %2868 = vmatmul.mubr.msk.bf16.vlgmr.msra.gmra.mxu1 %vm726_vm0, %v688_v55  ;;  %v674_v4 = vmax.f32 %v658_v15, 0.0  ;;  %v676_v12 = vmax.f32 %v660_v19, 0.0  ;;  %2888 = vmatpush3.bf16.msra.mxu0 %v3053_v27 }
 0x1a2   :  { %v652_v59 = vadd.f32 %v3866_v31, %v629_v50  ;;  %v670_v1 = vmax.f32 %v654_v61, 0.0  ;;  %v657_v7 = vadd.f32 %v3866_v31, %v634_v53  ;;  %2889 = vmatprep.subr.bf16.mxu0 %v3054_v33 }
 0x1a3   :  { %v693_v26 = vpack.c.bf16 %v676_v12, %v675_v23 }
 0x1a4   :  { %v668_v6 = vmax.f32 %v652_v59, 0.0  ;;  %v690_v16 = vpack.c.bf16 %v670_v1, %v669_v8  ;;  %v673_v20 = vmax.f32 %v657_v7, 0.0 }
 0x1a5   :  { %2890 = vmatpush3.bf16.msra.mxu0 %v3054_v33 }
 0x1a6   :  { %v689_v13 = vpack.c.bf16 %v668_v6, %v667_v5  ;;  %v692_v24 = vpack.c.bf16 %v674_v4, %v673_v20 }
 0x1a8   :  { %2871 = vmatprep.mubr.msk.bf16.mxu1 %vm726_vm0, %v689_v13 }
 0x1a9   :  { %2872 = vmatmul.mubr.msk.bf16.gmra.mxu1 %vm726_vm0, %v690_v16 }
 0x1aa   :  { %2875 = vmatprep.mubr.msk.bf16.mxu1 %vm726_vm0, %v691_v17 }
 0x1b1   :  { %2876 = vmatmul.mubr.msk.bf16.gmra.mxu1 %vm726_vm0, %v692_v24 }
 0x1b2   :  { %2879 = vmatprep.mubr.msk.bf16.mxu1 %vm726_vm0, %v693_v26 }
 0x1b9   :  { %2880 = vmatmul.mubr.msk.bf16.gmra.mxu1 %vm726_vm0, %v694_v32 }
 0x1c8   :  { %v881_v39 = vpop.permute.xlu0 %880 }
 0x1cc   :  { %v883_v41 = vpop.permute.xlu0 %882 }
 0x1d0   :  { %v885_v36 = vpop.permute.xlu1 %884 }
 0x1d4   :  { %v887_v49 = vpop.permute.xlu1 %886 }
 0x1d8   :  { %v889_v1 = vpop.permute.xlu0 %888 }
 0x1dc   :  { %v891_v63 = vpop.permute.xlu1 %890 }
 0x1e0   :  { %v893_v15 = vpop.permute.xlu0 %892 }
 0x1e4   :  { %v895_v8 = vpop.permute.xlu1 %894 }
 0x1e8   :  { %v897_v24 = vpop.permute.xlu0 %896 }
 0x1ec   :  { %v899_v10 = vpop.permute.xlu1 %898 }
 0x1f0   :  { %v901_v33 = vpop.permute.xlu0 %900 }
 0x1f4   :  { %v903_v32 = vpop.permute.xlu1 %902 }
 0x261   :  { %v2869_v31 = vpop.f32.mrf.mxu1 }
 0x262   :  { %v794_v38 = vadd.f32 %v2869_v31, %v3904_v34 }
 0x263   :  { %v785_v35 = vpop.f32.mrf.mxu1 }
 0x264   :  { %v786_v37 = vadd.f32 %v3904_v34, %v785_v35  ;;  %v850_v47 = vmax.f32 %v794_v38, 0.0 }
 0x265   :  { %v2870_v40 = vpop.f32.mrf.mxu1 }
 0x266   :  { %v797_v42 = vadd.f32 %v2870_v40, %v3904_v34  ;;  %v848_v44 = vmax.f32 %v786_v37, 0.0  ;;  %v930_v60 = vadd.f32 %v885_v36, %v850_v47  ;;  %v907_v40 = vpop.permute.xlu1 %906 }
 0x267   :  { %v788_v43 = vpop.f32.mrf.mxu1 }
 0x268   :  { %v851_v45 = vmax.f32 %v797_v42, 0.0  ;;  %v789_v46 = vadd.f32 %v3904_v34, %v788_v43  ;;  %v928_v55 = vadd.f32 %v881_v39, %v848_v44 }
 0x269   :  { %v2873_v48 = vpop.f32.mrf.mxu1 }
 0x26a   :  { %v849_v51 = vmax.f32 %v789_v46, 0.0  ;;  %v931_v52 = vadd.f32 %v887_v49, %v851_v45  ;;  %v810_v61 = vadd.f32 %v2873_v48, %v3904_v34  ;;  %v905_v46 = vpop.permute.xlu0 %904 }
 0x26b   :  { %v801_v54 = vpop.f32.mrf.mxu1 }
 0x26c   :  { %v929_v57 = vadd.f32 %v883_v41, %v849_v51  ;;  %v802_v58 = vadd.f32 %v3904_v34, %v801_v54  ;;  %v953_v59 = vpack.c.bf16 %v931_v52, %v930_v60  ;;  %v854_v6 = vmax.f32 %v810_v61, 0.0  ;;  %v911_v41 = vpop.permute.xlu1 %910 }
 0x26d   :  { %v2874_v50 = vpop.f32.mrf.mxu1 }
 0x26e   :  { %v952_v56 = vpack.c.bf16 %v929_v57, %v928_v55  ;;  %v813_v62 = vadd.f32 %v2874_v50, %v3904_v34  ;;  %v852_v2 = vmax.f32 %v802_v58, 0.0  ;;  %v934_v7 = vadd.f32 %v893_v15, %v854_v6  ;;  %v909_v55 = vpop.permute.xlu0 %908 }
 0x26f   :  { %v804_v0 = vpop.f32.mrf.mxu1 }
 0x270   :  { %v855_v3 = vmax.f32 %v813_v62, 0.0  ;;  %v805_v5 = vadd.f32 %v3904_v34, %v804_v0  ;;  %2891 = vmatprep.mubr.msk.bf16.mxu0 %vm726_vm0, %v952_v56  ;;  %v932_v16 = vadd.f32 %v889_v1, %v852_v2  ;;  %v3944_v56 = vld [vmem:[#allocation13] ss:$0 sm:$0xff] }
 0x271   :  { %v2877_v53 = vpop.f32.mrf.mxu1  ;;  %2892 = vmatmul.mubr.msk.bf16.vlgmr.msra.gmra.mxu0 %vm726_vm0, %v953_v59 }
 0x272   :  { %v853_v9 = vmax.f32 %v805_v5, 0.0  ;;  %v935_v11 = vadd.f32 %v895_v8, %v855_v3  ;;  %v826_v14 = vadd.f32 %v2877_v53, %v3904_v34 }
 0x273   :  { %v817_v13 = vpop.f32.mrf.mxu1 }
 0x274   :  { %v933_v17 = vadd.f32 %v891_v63, %v853_v9  ;;  %v818_v19 = vadd.f32 %v3904_v34, %v817_v13  ;;  %v955_v21 = vpack.c.bf16 %v935_v11, %v934_v7  ;;  %v858_v29 = vmax.f32 %v826_v14, 0.0  ;;  %v3938_v63 = vld [vmem:[%s4723_s10] sm:$0xff]  }
 0x275   :  { %v2878_v4 = vpop.f32.mrf.mxu1 }
 0x276   :  { %v954_v12 = vpack.c.bf16 %v933_v17, %v932_v16  ;;  %v829_v20 = vadd.f32 %v2878_v4, %v3904_v34  ;;  %v856_v25 = vmax.f32 %v818_v19, 0.0  ;;  %v938_v37 = vadd.f32 %v901_v33, %v858_v29 }
 0x277   :  { %v820_v23 = vpop.f32.mrf.mxu1 }
 0x278   :  { %v859_v26 = vmax.f32 %v829_v20, 0.0  ;;  %v821_v28 = vadd.f32 %v3904_v34, %v820_v23  ;;  %2895 = vmatprep.mubr.msk.bf16.mxu0 %vm726_vm0, %v954_v12  ;;  %v936_v31 = vadd.f32 %v897_v24, %v856_v25 }
 0x279   :  { %v2881_v30 = vpop.f32.mrf.mxu1  ;;  %2896 = vmatmul.mubr.msk.bf16.gmra.mxu0 %vm726_vm0, %v955_v21 }
 0x27a   :  { %v857_v22 = vmax.f32 %v821_v28, 0.0  ;;  %v939_v18 = vadd.f32 %v903_v32, %v859_v26  ;;  %v842_v39 = vadd.f32 %v2881_v30, %v3904_v34 }
 0x27b   :  { %v833_v27 = vpop.f32.mrf.mxu1 }
 0x27c   :  { %v937_v35 = vadd.f32 %v899_v10, %v857_v22  ;;  %v834_v36 = vadd.f32 %v3904_v34, %v833_v27  ;;  %v957_v44 = vpack.c.bf16 %v939_v18, %v938_v37  ;;  %v862_v51 = vmax.f32 %v842_v39, 0.0 }
 0x27d   :  { %v2882_v38 = vpop.f32.mrf.mxu1 }
 0x27e   :  { %v956_v42 = vpack.c.bf16 %v937_v35, %v936_v31  ;;  %v845_v43 = vadd.f32 %v2882_v38, %v3904_v34  ;;  %v860_v47 = vmax.f32 %v834_v36, 0.0  ;;  %v942_v60 = vadd.f32 %v909_v55, %v862_v51 }
 0x27f   :  { %v836_v45 = vpop.f32.mrf.mxu1 }
 0x280   :  { %v863_v48 = vmax.f32 %v845_v43, 0.0  ;;  %v837_v49 = vadd.f32 %v3904_v34, %v836_v45  ;;  %2899 = vmatprep.mubr.msk.bf16.mxu0 %vm726_vm0, %v956_v42  ;;  %v940_v57 = vadd.f32 %v905_v46, %v860_v47  ;;  %v3933_v34 = vld [vmem:[%s4723_s10 + $0x8] sm:$0xff]   ;;  %s3566_s10 = smov 96  }
 0x281   :  { %2900 = vmatmul.mubr.msk.bf16.gmra.mxu0 %vm726_vm0, %v957_v44  ;;  %2907 = vmatprep.subr.bf16.mxu1 %v3933_v34 }
 0x282   :  { %v861_v52 = vmax.f32 %v837_v49, 0.0  ;;  %v943_v54 = vadd.f32 %v911_v41, %v863_v48  ;;  %2908 = vmatpush3.bf16.msra.mxu1 %v3933_v34 }
 0x283   :  { %2909 = vmatprep.subr.bf16.mxu1 %v3938_v63 }
 0x284   :  { %v941_v58 = vadd.f32 %v907_v40, %v861_v52  ;;  %v959_v50 = vpack.c.bf16 %v943_v54, %v942_v60 }
 0x286   :  { %v958_v61 = vpack.c.bf16 %v941_v58, %v940_v57  ;;  %2910 = vmatpush3.bf16.msra.mxu1 %v3938_v63 }
 0x288   :  { %2903 = vmatprep.mubr.msk.bf16.mxu0 %vm726_vm0, %v958_v61 }
 0x289   :  { %2904 = vmatmul.mubr.msk.bf16.gmra.mxu0 %vm726_vm0, %v959_v50 }
 0x331   :  { %v2893_v62 = vpop.f32.mrf.mxu0 }
 0x332   :  { %v3947_v59 = vadd.f32 %v2893_v62, %v3944_v56 }
 0x333   :  { %v1049_v0 = vpop.f32.mrf.mxu0 }
 0x334   :  { %v3950_v1 = vadd.f32 %v3944_v56, %v1049_v0  ;;  %v1130_v2 = vmul.f32 0.5, %v3947_v59 }
 0x335   :  { %v2894_v3 = vpop.f32.mrf.mxu0 }
 0x336   :  { %v1128_v5 = vmul.f32 0.5, %v3950_v1  ;;  %v3955_v6 = vadd.f32 %v2894_v3, %v3944_v56  ;;  %v1148_v11 = vmul.f32 1.442695, %v1130_v2 }
 0x337   :  { %v1052_v53 = vpop.f32.mrf.mxu0 }
 0x338   :  { %v1144_v8 = vmul.f32 1.442695, %v1128_v5  ;;  %v3958_v9 = vadd.f32 %v3944_v56, %v1052_v53  ;;  %v1131_v13 = vmul.f32 0.5, %v3955_v6 }
 0x339   :  { %v2897_v15 = vpop.f32.mrf.mxu0 }
 0x33a   :  { %3063 = vpow2.f32 %v1144_v8  ;;  %v1129_v16 = vmul.f32 0.5, %v3958_v9  ;;  %v3963_v17 = vadd.f32 %v2897_v15, %v3944_v56  ;;  %v1150_v4 = vmul.f32 1.442695, %v1131_v13 }
 0x33b   :  { %v1065_v19 = vpop.f32.mrf.mxu0  ;;  %3065 = vpow2.f32 %v1148_v11 }
 0x33c   :  { %v1146_v7 = vmul.f32 1.442695, %v1129_v16  ;;  %v3966_v14 = vadd.f32 %v3944_v56, %v1065_v19  ;;  %v1134_v10 = vmul.f32 0.5, %v3963_v17 }
 0x33d   :  { %v2898_v12 = vpop.f32.mrf.mxu0 }
 0x33e   :  { %3067 = vpow2.f32 %v1146_v7  ;;  %v1132_v20 = vmul.f32 0.5, %v3966_v14  ;;  %v3971_v21 = vadd.f32 %v2898_v12, %v3944_v56  ;;  %v1156_v26 = vmul.f32 1.442695, %v1134_v10 }
 0x33f   :  { %v1068_v23 = vpop.f32.mrf.mxu0  ;;  %3069 = vpow2.f32 %v1150_v4 }
 0x340   :  { %v1152_v24 = vmul.f32 1.442695, %v1132_v20  ;;  %v3974_v25 = vadd.f32 %v3944_v56, %v1068_v23  ;;  %v1135_v28 = vmul.f32 0.5, %v3971_v21 }
 0x341   :  { %v2901_v29 = vpop.f32.mrf.mxu0 }
 0x342   :  { %3071 = vpow2.f32 %v1152_v24  ;;  %v1133_v30 = vmul.f32 0.5, %v3974_v25  ;;  %v3979_v32 = vadd.f32 %v2901_v29, %v3944_v56  ;;  %v1158_v33 = vmul.f32 1.442695, %v1135_v28  ;;  %v4028_v24 = vld [vmem:[#allocation14] ss:$0 sm:$0xff] }
 0x343   :  { %v1081_v22 = vpop.f32.mrf.mxu0  ;;  %3073 = vpow2.f32 %v1156_v26  ;;  %v1113_v26 = vld [vmem:[%s4715_s2 + $0x8] sm:$0xff] }
 0x344   :  { %v1154_v18 = vmul.f32 1.442695, %v1133_v30  ;;  %v3982_v27 = vadd.f32 %v3944_v56, %v1081_v22  ;;  %v1138_v31 = vmul.f32 0.5, %v3979_v32  ;;  %v1114_v30 = vld [vmem:[%s4715_s2 + $0x10] sm:$0xff] }
 0x345   :  { %v2902_v35 = vpop.f32.mrf.mxu0 }
 0x346   :  { %3075 = vpow2.f32 %v1154_v18  ;;  %v1136_v36 = vmul.f32 0.5, %v3982_v27  ;;  %v3987_v37 = vadd.f32 %v2902_v35, %v3944_v56  ;;  %v1164_v43 = vmul.f32 1.442695, %v1138_v31 }
 0x347   :  { %v3064_v39 = vpop.eup %3063  ;;  %v1084_v38 = vpop.f32.mrf.mxu0  ;;  %3077 = vpow2.f32 %v1158_v33  ;;  %v1115_v33 = vld [vmem:[%s4715_s2 + $0x18] sm:$0xff] }
 0x348   :  { %v1160_v40 = vmul.f32 1.442695, %v1136_v36  ;;  %v3990_v42 = vadd.f32 %v3944_v56, %v1084_v38  ;;  %1192 = vrot.lane.b32.xlu0 %v3064_v39, %s3566_s10  ;;  %v1139_v44 = vmul.f32 0.5, %v3987_v37  ;;  %v3066_v46 = vpop.eup %3065  ;;  %v1116_v38 = vld [vmem:[%s4715_s2 + $0x20] sm:$0xff] }
 0x349   :  { %v2905_v45 = vpop.f32.mrf.mxu0 }
 0x34a   :  { %3079 = vpow2.f32 %v1160_v40  ;;  %v1137_v47 = vmul.f32 0.5, %v3990_v42  ;;  %v3996_v48 = vadd.f32 %v2905_v45, %v3944_v56  ;;  %v1166_v54 = vmul.f32 1.442695, %v1139_v44 }
 0x34b   :  { %v3068_v49 = vpop.eup %3067  ;;  %v1097_v51 = vpop.f32.mrf.mxu0  ;;  %3081 = vpow2.f32 %v1164_v43 }
 0x34c   :  { %v1162_v41 = vmul.f32 1.442695, %v1137_v47  ;;  %v3999_v52 = vadd.f32 %v3944_v56, %v1097_v51  ;;  %1194 = vrot.lane.b32.xlu1 %v3068_v49, %s3566_s10  ;;  %1196 = vrot.lane.b32.xlu0 %v3066_v46, %s3566_s10  ;;  %v1142_v55 = vmul.f32 0.5, %v3996_v48  ;;  %v3070_v58 = vpop.eup %3069  ;;  %v1118_v49 = vld [vmem:[%s4715_s2 + $0x30] sm:$0xff] }
 0x34d   :  { %v2906_v57 = vpop.f32.mrf.mxu0 }
 0x34e   :  { %3083 = vpow2.f32 %v1162_v41  ;;  %v1140_v60 = vmul.f32 0.5, %v3999_v52  ;;  %v4006_v61 = vadd.f32 %v2906_v57, %v3944_v56  ;;  %v1172_v3 = vmul.f32 1.442695, %v1142_v55 }
 0x34f   :  { %v3072_v50 = vpop.eup %3071  ;;  %v1100_v62 = vpop.f32.mrf.mxu0  ;;  %3085 = vpow2.f32 %v1166_v54 }
 0x350   :  { %v1168_v0 = vmul.f32 1.442695, %v1140_v60  ;;  %v4009_v2 = vadd.f32 %v3944_v56, %v1100_v62  ;;  %1198 = vrot.lane.b32.xlu1 %v3070_v58, %s3566_s10  ;;  %1200 = vrot.lane.b32.xlu0 %v3072_v50, %s3566_s10  ;;  %v3074_v5 = vpop.eup %3073  ;;  %v1143_v53 = vmul.f32 0.5, %v4006_v61  ;;  %v1120_v60 = vld [vmem:[%s4715_s2 + $0x40] sm:$0xff] }
 0x352   :  { %3087 = vpow2.f32 %v1168_v0  ;;  %v1141_v8 = vmul.f32 0.5, %v4009_v2  ;;  %v1174_v15 = vmul.f32 1.442695, %v1143_v53 }
 0x353   :  { %v3076_v11 = vpop.eup %3075  ;;  %3089 = vpow2.f32 %v1172_v3 }
 0x354   :  { %v1170_v13 = vmul.f32 1.442695, %v1141_v8  ;;  %1202 = vrot.lane.b32.xlu1 %v3076_v11, %s3566_s10  ;;  %1204 = vrot.lane.b32.xlu0 %v3074_v5, %s3566_s10  ;;  %v3078_v56 = vpop.eup %3077  ;;  %v1122_v8 = vld [vmem:[%s4715_s2 + $0x50] sm:$0xff] }
 0x356   :  { %3091 = vpow2.f32 %v1170_v13 }
 0x357   :  { %v3080_v16 = vpop.eup %3079  ;;  %3093 = vpow2.f32 %v1174_v15 }
 0x358   :  { %1206 = vrot.lane.b32.xlu1 %v3078_v56, %s3566_s10  ;;  %1208 = vrot.lane.b32.xlu0 %v3080_v16, %s3566_s10  ;;  %v3082_v19 = vpop.eup %3081 }
 0x35b   :  { %v3084_v7 = vpop.eup %3083 }
 0x35c   :  { %1210 = vrot.lane.b32.xlu1 %v3084_v7, %s3566_s10  ;;  %1212 = vrot.lane.b32.xlu0 %v3082_v19, %s3566_s10  ;;  %v3086_v4 = vpop.eup %3085  ;;  %v1124_v7 = vld [vmem:[%s4715_s2 + $0x60] sm:$0xff] }
 0x35f   :  { %v3088_v10 = vpop.eup %3087 }
 0x360   :  { %1214 = vrot.lane.b32.xlu1 %v3086_v4, %s3566_s10  ;;  %1216 = vrot.lane.b32.xlu0 %v3088_v10, %s3566_s10  ;;  %v3090_v12 = vpop.eup %3089 }
 0x363   :  { %v3092_v20 = vpop.eup %3091 }
 0x364   :  { %1218 = vrot.lane.b32.xlu1 %v3092_v20, %s3566_s10  ;;  %1220 = vrot.lane.b32.xlu0 %v3090_v12, %s3566_s10  ;;  %v3094_v23 = vpop.eup %3093 }
 0x368   :  { %1222 = vrot.lane.b32.xlu1 %v3094_v23, %s3566_s10  ;;  %1451 = vrot.lane.b32.xlu0 %v3933_v34, %s3566_s10 }
 0x36c   :  { %1449 = vrot.lane.b32.xlu1 %v3938_v63, %s3566_s10  ;;  %1455 = vrot.lane.b32.xlu0 %v4028_v24, %s3566_s10 }
 0x370   :  { %1605 = vrot.lane.b32.xlu1 %v3933_v34, %s3554_s21  ;;  %1603 = vrot.lane.b32.xlu0 %v3938_v63, %s3554_s21 }
 0x374   :  { %1609 = vrot.lane.b32.xlu1 %v4028_v24, %s3554_s21  ;;  %1759 = vrot.lane.b32.xlu0 %v3933_v34, %s3567_s11  ;;  %v1112_v34 = vld [vmem:[%s4715_s2] sm:$0xff] }
 0x378   :  { %1757 = vrot.lane.b32.xlu1 %v3938_v63, %s3567_s11  ;;  %1763 = vrot.lane.b32.xlu0 %v4028_v24, %s3567_s11 }
 0x37c   :  { %2420 = vrot.lane.b32.xlu1 %v3950_v1, %s3554_s21  ;;  %2422 = vrot.lane.b32.xlu0 %v3958_v9, %s3554_s21 }
 0x380   :  { %2424 = vrot.lane.b32.xlu1 %v3947_v59, %s3554_s21  ;;  %2426 = vrot.lane.b32.xlu0 %v3955_v6, %s3554_s21 }
 0x384   :  { %2428 = vrot.lane.b32.xlu1 %v3966_v14, %s3554_s21  ;;  %2430 = vrot.lane.b32.xlu0 %v3974_v25, %s3554_s21 }
 0x388   :  { %2432 = vrot.lane.b32.xlu1 %v3963_v17, %s3554_s21  ;;  %2434 = vrot.lane.b32.xlu0 %v3971_v21, %s3554_s21 }
 0x38c   :  { %2436 = vrot.lane.b32.xlu1 %v3982_v27, %s3554_s21 }
 0x3ba   :  { %v1193_v63 = vpop.permute.xlu0 %1192 }
 0x3bb   :  { %v1240_v28 = vmul.f32 %v1193_v63, %v1112_v34 }
 0x3bd   :  { %v4077_v31 = vadd.f32 %v1240_v28, %v3950_v1  ;;  %v1117_v1 = vld [vmem:[%s4715_s2 + $0x28] sm:$0xff] }
 0x3be   :  { %v1195_v29 = vpop.permute.xlu1 %1194  ;;  %v1197_v22 = vpop.permute.xlu0 %1196 }
 0x3bf   :  { %v1241_v18 = vmul.f32 %v1195_v29, %v1113_v26  ;;  %v1242_v36 = vmul.f32 %v1197_v22, %v1114_v30  ;;  %v1126_v26 = vld [vmem:[%s4715_s2 + $0x70] sm:$0xff]  ;;  %v1127_v22 = vld [vmem:[%s4715_s2 + $0x78] sm:$0xff] }
 0x3c1   :  { %v4080_v35 = vadd.f32 %v1241_v18, %v3958_v9  ;;  %v4091_v45 = vadd.f32 %v1242_v36, %v3947_v59  ;;  %v1119_v59 = vld [vmem:[%s4715_s2 + $0x38] sm:$0xff] }
 0x3c2   :  { %v1199_v39 = vpop.permute.xlu1 %1198  ;;  %v1201_v40 = vpop.permute.xlu0 %1200 }
 0x3c3   :  { %v1277_v43 = vpack.c.bf16 %v4080_v35, %v4077_v31  ;;  %v1243_v44 = vmul.f32 %v1199_v39, %v1115_v33  ;;  %v1244_v46 = vmul.f32 %v1201_v40, %v1116_v38 }
 0x3c5   :  { %v4094_v9 = vadd.f32 %v1243_v44, %v3955_v6  ;;  %2911 = vmatprep.mubr.msk.bf16.mxu1 %vm1303_vm1, %v1277_v43  ;;  %v4106_v6 = vadd.f32 %v1244_v46, %v3966_v14  ;;  %v1121_v14 = vld [vmem:[%s4715_s2 + $0x48] sm:$0xff] }
 0x3c6   :  { %v1203_v47 = vpop.permute.xlu1 %1202  ;;  %v1205_v51 = vpop.permute.xlu0 %1204 }
 0x3c7   :  { %v1278_v41 = vpack.c.bf16 %v4094_v9, %v4091_v45  ;;  %v1245_v54 = vmul.f32 %v1203_v47, %v1117_v1  ;;  %v1246_v57 = vmul.f32 %v1205_v51, %v1118_v49 }
 0x3c9   :  { %v4109_v55 = vadd.f32 %v1245_v54, %v3974_v25  ;;  %2912 = vmatmul.mubr.msk.bf16.vlgmr.msra.gmra.mxu1 %vm1303_vm1, %v1278_v41  ;;  %v4121_v25 = vadd.f32 %v1246_v57, %v3963_v17  ;;  %v1123_v17 = vld [vmem:[%s4715_s2 + $0x58] sm:$0xff] }
 0x3ca   :  { %v1207_v58 = vpop.permute.xlu1 %1206  ;;  %v1209_v50 = vpop.permute.xlu0 %1208 }
 0x3cb   :  { %v1279_v62 = vpack.c.bf16 %v4109_v55, %v4106_v6  ;;  %v1247_v0 = vmul.f32 %v1207_v58, %v1119_v59  ;;  %v1248_v5 = vmul.f32 %v1209_v50, %v1120_v60 }
 0x3cd   :  { %v4124_v3 = vadd.f32 %v1247_v0, %v3971_v21  ;;  %2915 = vmatprep.mubr.msk.bf16.mxu1 %vm1303_vm1, %v1279_v62  ;;  %v4136_v21 = vadd.f32 %v1248_v5, %v3982_v27  ;;  %v1125_v27 = vld [vmem:[%s4715_s2 + $0x68] sm:$0xff] }
 0x3ce   :  { %v1211_v53 = vpop.permute.xlu1 %1210  ;;  %v1213_v11 = vpop.permute.xlu0 %1212 }
 0x3cf   :  { %v1280_v13 = vpack.c.bf16 %v4124_v3, %v4121_v25  ;;  %v1249_v56 = vmul.f32 %v1211_v53, %v1121_v14  ;;  %v1250_v16 = vmul.f32 %v1213_v11, %v1122_v8 }
 0x3d1   :  { %v4139_v15 = vadd.f32 %v1249_v56, %v3990_v42  ;;  %2916 = vmatmul.mubr.msk.bf16.gmra.mxu1 %vm1303_vm1, %v1280_v13  ;;  %v4151_v20 = vadd.f32 %v1250_v16, %v3979_v32 }
 0x3d2   :  { %v1215_v19 = vpop.permute.xlu1 %1214  ;;  %v1217_v4 = vpop.permute.xlu0 %1216 }
 0x3d3   :  { %v1281_v10 = vpack.c.bf16 %v4139_v15, %v4136_v21  ;;  %v1251_v12 = vmul.f32 %v1215_v19, %v1123_v17  ;;  %v1252_v34 = vmul.f32 %v1217_v4, %v1124_v7 }
 0x3d5   :  { %v4154_v23 = vadd.f32 %v1251_v12, %v3987_v37  ;;  %2919 = vmatprep.mubr.msk.bf16.mxu1 %vm1303_vm1, %v1281_v10  ;;  %v4166_v18 = vadd.f32 %v1252_v34, %v3999_v52 }
 0x3d6   :  { %v1219_v63 = vpop.permute.xlu1 %1218  ;;  %v1221_v28 = vpop.permute.xlu0 %1220 }
 0x3d7   :  { %v1282_v29 = vpack.c.bf16 %v4154_v23, %v4151_v20  ;;  %v1253_v30 = vmul.f32 %v1219_v63, %v1125_v27  ;;  %v1254_v36 = vmul.f32 %v1221_v28, %v1126_v26 }
 0x3d9   :  { %v4169_v33 = vadd.f32 %v1253_v30, %v4009_v2  ;;  %2920 = vmatmul.mubr.msk.bf16.gmra.mxu1 %vm1303_vm1, %v1282_v29  ;;  %v4175_v44 = vadd.f32 %v1254_v36, %v3996_v48 }
 0x3da   :  { %v1223_v39 = vpop.permute.xlu1 %1222  ;;  %v1452_v38 = vpop.permute.xlu0 %1451 }
 0x3db   :  { %v1283_v40 = vpack.c.bf16 %v4169_v33, %v4166_v18  ;;  %v1255_v43 = vmul.f32 %v1223_v39, %v1127_v22  ;;  %2927 = vmatprep.subr.bf16.mxu0 %v1452_v38 }
 0x3dc   :  { %2928 = vmatpush3.bf16.msra.mxu0 %v1452_v38 }
 0x3dd   :  { %v4178_v1 = vadd.f32 %v1255_v43, %v4006_v61  ;;  %2923 = vmatprep.mubr.msk.bf16.mxu1 %vm1303_vm1, %v1283_v40 }
 0x3de   :  { %v1450_v46 = vpop.permute.xlu1 %1449  ;;  %v4181_v47 = vpop.permute.xlu0 %1455 }
 0x3df   :  { %v1284_v49 = vpack.c.bf16 %v4178_v1, %v4175_v44  ;;  %2929 = vmatprep.subr.bf16.mxu0 %v1450_v46 }
 0x3e0   :  { %2930 = vmatpush3.bf16.msra.mxu0 %v1450_v46 }
 0x3e1   :  { %2924 = vmatmul.mubr.msk.bf16.gmra.mxu1 %vm1303_vm1, %v1284_v49 }
 0x3e2   :  { %v1606_v51 = vpop.permute.xlu1 %1605  ;;  %v1604_v41 = vpop.permute.xlu0 %1603 }
 0x3e3   :  { %2947 = vmatprep.subr.bf16.mxu1 %v1606_v51 }
 0x3e4   :  { %2948 = vmatpush3.bf16.msra.mxu1 %v1606_v51 }
 0x3e5   :  { %2949 = vmatprep.subr.bf16.mxu1 %v1604_v41 }
 0x3e6   :  { %v1760_v54 = vpop.permute.xlu0 %1759  ;;  %v4195_v34 = vpop.permute.xlu1 %1609 }
 0x3e7   :  { %2967 = vmatprep.subr.bf16.mxu0 %v1760_v54 }
 0x3e8   :  { %2950 = vmatpush3.bf16.msra.mxu1 %v1604_v41 }
 0x3ea   :  { %v1758_v43 = vpop.permute.xlu1 %1757 }
 0x489   :  { %v2913_v59 = vpop.f32.mrf.mxu1 }
 0x48a   :  { %v1371_v62 = vadd.f32 %v2913_v59, %v4028_v24 }
 0x48b   :  { %v1362_v57 = vpop.f32.mrf.mxu1 }
 0x48c   :  { %v1363_v58 = vadd.f32 %v4028_v24, %v1362_v57 }
 0x48d   :  { %v2914_v60 = vpop.f32.mrf.mxu1 }
 0x48e   :  { %v1374_v50 = vadd.f32 %v2914_v60, %v4028_v24  ;;  %3095 = vtanh.f32 %v1363_v58 }
 0x48f   :  { %v1365_v0 = vpop.f32.mrf.mxu1 }
 0x490   :  { %v1366_v14 = vadd.f32 %v4028_v24, %v1365_v0  ;;  %3097 = vtanh.f32 %v1374_v50 }
 0x491   :  { %v2917_v5 = vpop.f32.mrf.mxu1 }
 0x492   :  { %3099 = vtanh.f32 %v1366_v14  ;;  %v1387_v56 = vadd.f32 %v2917_v5, %v4028_v24 }
 0x493   :  { %3101 = vtanh.f32 %v1371_v62  ;;  %v1378_v53 = vpop.f32.mrf.mxu1 }
 0x494   :  { %v1379_v8 = vadd.f32 %v4028_v24, %v1378_v53 }
 0x495   :  { %v2918_v11 = vpop.f32.mrf.mxu1 }
 0x496   :  { %v1390_v13 = vadd.f32 %v2918_v11, %v4028_v24  ;;  %3103 = vtanh.f32 %v1379_v8 }
 0x497   :  { %v1381_v17 = vpop.f32.mrf.mxu1 }
 0x498   :  { %v1382_v16 = vadd.f32 %v4028_v24, %v1381_v17  ;;  %3105 = vtanh.f32 %v1390_v13 }
 0x499   :  { %v2921_v19 = vpop.f32.mrf.mxu1 }
 0x49a   :  { %3107 = vtanh.f32 %v1382_v16  ;;  %v1403_v28 = vadd.f32 %v2921_v19, %v4028_v24 }
 0x49b   :  { %3109 = vtanh.f32 %v1387_v56  ;;  %v1394_v7 = vpop.f32.mrf.mxu1  ;;  %v3096_v10 = vpop.eup %3095 }
 0x49c   :  { %v1395_v4 = vadd.f32 %v4028_v24, %v1394_v7 }
 0x49d   :  { %v2922_v12 = vpop.f32.mrf.mxu1  ;;  %v3098_v27 = vpop.eup %3097 }
 0x49e   :  { %v1406_v63 = vadd.f32 %v2922_v12, %v4028_v24  ;;  %3111 = vtanh.f32 %v1395_v4 }
 0x49f   :  { %v3100_v26 = vpop.eup %3099  ;;  %v1397_v29 = vpop.f32.mrf.mxu1 }
 0x4a0   :  { %v3102_v30 = vpop.eup %3101  ;;  %v1398_v22 = vadd.f32 %v4028_v24, %v1397_v29  ;;  %v1441_v36 = vpack.c.bf16 %v3100_v26, %v3096_v10  ;;  %3113 = vtanh.f32 %v1406_v63 }
 0x4a1   :  { %v1442_v39 = vpack.c.bf16 %v3098_v27, %v3102_v30  ;;  %v2925_v38 = vpop.f32.mrf.mxu1 }
 0x4a2   :  { %3115 = vtanh.f32 %v1398_v22  ;;  %2931 = vmatprep.mubr.msk.bf16.mxu0 %vm1303_vm1, %v1441_v36  ;;  %v1419_v58 = vadd.f32 %v2925_v38, %v4028_v24 }
 0x4a3   :  { %3117 = vtanh.f32 %v1403_v28  ;;  %v1410_v40 = vpop.f32.mrf.mxu1  ;;  %2932 = vmatmul.mubr.msk.bf16.vlgmr.msra.gmra.mxu0 %vm1303_vm1, %v1442_v39  ;;  %v3104_v49 = vpop.eup %3103 }
 0x4a4   :  { %v1411_v46 = vadd.f32 %v4028_v24, %v1410_v40  ;;  %2968 = vmatpush3.bf16.msra.mxu0 %v1760_v54 }
 0x4a5   :  { %v2926_v51 = vpop.f32.mrf.mxu1  ;;  %2969 = vmatprep.subr.bf16.mxu0 %v1758_v43  ;;  %v3106_v41 = vpop.eup %3105 }
 0x4a6   :  { %v1422_v59 = vadd.f32 %v2926_v51, %v4028_v24  ;;  %3119 = vtanh.f32 %v1411_v46 }
 0x4a7   :  { %v3108_v57 = vpop.eup %3107  ;;  %v1413_v60 = vpop.f32.mrf.mxu1 }
 0x4a8   :  { %v3110_v50 = vpop.eup %3109  ;;  %v1414_v62 = vadd.f32 %v4028_v24, %v1413_v60  ;;  %v1443_v0 = vpack.c.bf16 %v3108_v57, %v3104_v49  ;;  %2970 = vmatpush3.bf16.msra.mxu0 %v1758_v43  ;;  %3121 = vtanh.f32 %v1422_v59 }
 0x4a9   :  { %v1444_v14 = vpack.c.bf16 %v3106_v41, %v3110_v50 }
 0x4aa   :  { %3123 = vtanh.f32 %v1414_v62  ;;  %2935 = vmatprep.mubr.msk.bf16.mxu0 %vm1303_vm1, %v1443_v0 }
 0x4ab   :  { %3125 = vtanh.f32 %v1419_v58  ;;  %2936 = vmatmul.mubr.msk.bf16.gmra.mxu0 %vm1303_vm1, %v1444_v14  ;;  %v3112_v54 = vpop.eup %3111 }
 0x4ad   :  { %v3114_v5 = vpop.eup %3113 }
 0x4af   :  { %v3116_v53 = vpop.eup %3115 }
 0x4b0   :  { %v3118_v8 = vpop.eup %3117  ;;  %v1445_v11 = vpack.c.bf16 %v3116_v53, %v3112_v54 }
 0x4b1   :  { %v1446_v13 = vpack.c.bf16 %v3114_v5, %v3118_v8 }
 0x4b2   :  { %2939 = vmatprep.mubr.msk.bf16.mxu0 %vm1303_vm1, %v1445_v11 }
 0x4b3   :  { %2940 = vmatmul.mubr.msk.bf16.gmra.mxu0 %vm1303_vm1, %v1446_v13  ;;  %v3120_v24 = vpop.eup %3119 }
 0x4b5   :  { %v3122_v56 = vpop.eup %3121 }
 0x4b7   :  { %v3124_v17 = vpop.eup %3123 }
 0x4b8   :  { %v3126_v16 = vpop.eup %3125  ;;  %v1447_v19 = vpack.c.bf16 %v3124_v17, %v3120_v24 }
 0x4b9   :  { %v1448_v7 = vpack.c.bf16 %v3122_v56, %v3126_v16 }
 0x4ba   :  { %2943 = vmatprep.mubr.msk.bf16.mxu0 %vm1303_vm1, %v1447_v19 }
 0x4bb   :  { %2944 = vmatmul.mubr.msk.bf16.gmra.mxu0 %vm1303_vm1, %v1448_v7 }
 0x563   :  { %v2933_v4 = vpop.f32.mrf.mxu0 }
 0x564   :  { %v1525_v26 = vadd.f32 %v2933_v4, %v4181_v47 }
 0x565   :  { %v1516_v10 = vpop.f32.mrf.mxu0 }
 0x566   :  { %v1517_v12 = vadd.f32 %v1516_v10, %v4181_v47 }
 0x567   :  { %v2934_v27 = vpop.f32.mrf.mxu0 }
 0x568   :  { %v1528_v63 = vadd.f32 %v2934_v27, %v4181_v47  ;;  %3127 = vtanh.f32 %v1517_v12 }
 0x569   :  { %v1519_v28 = vpop.f32.mrf.mxu0 }
 0x56a   :  { %v1520_v29 = vadd.f32 %v1519_v28, %v4181_v47  ;;  %3129 = vtanh.f32 %v1528_v63 }
 0x56b   :  { %v2937_v30 = vpop.f32.mrf.mxu0 }
 0x56c   :  { %3131 = vtanh.f32 %v1520_v29  ;;  %v1541_v40 = vadd.f32 %v2937_v30, %v4181_v47 }
 0x56d   :  { %3133 = vtanh.f32 %v1525_v26  ;;  %v1532_v22 = vpop.f32.mrf.mxu0 }
 0x56e   :  { %v1533_v36 = vadd.f32 %v1532_v22, %v4181_v47 }
 0x56f   :  { %v2938_v39 = vpop.f32.mrf.mxu0 }
 0x570   :  { %v1544_v38 = vadd.f32 %v2938_v39, %v4181_v47  ;;  %3135 = vtanh.f32 %v1533_v36 }
 0x571   :  { %v1535_v43 = vpop.f32.mrf.mxu0 }
 0x572   :  { %v1536_v46 = vadd.f32 %v1535_v43, %v4181_v47  ;;  %3137 = vtanh.f32 %v1544_v38 }
 0x573   :  { %v2941_v49 = vpop.f32.mrf.mxu0 }
 0x574   :  { %3139 = vtanh.f32 %v1536_v46  ;;  %v1557_v62 = vadd.f32 %v2941_v49, %v4181_v47  ;;  %v3057_v49 = vld [vmem:[#allocation16 + $0x10] ss:$8 sps:$4 sm:$0xff]  }
 0x575   :  { %3141 = vtanh.f32 %v1541_v40  ;;  %v1548_v51 = vpop.f32.mrf.mxu0  ;;  %v3128_v59 = vpop.eup %3127 }
 0x576   :  { %v1549_v41 = vadd.f32 %v1548_v51, %v4181_v47  ;;  %v3059_v51 = vld [vmem:[#allocation16 + $0x14] ss:$8 sps:$4 sm:$0xff]  }
 0x577   :  { %v2942_v57 = vpop.f32.mrf.mxu0  ;;  %v3130_v58 = vpop.eup %3129  ;;  %1999 = vmatprep.subr.bf16.mxu1 %v3059_v51 }
 0x578   :  { %v1560_v60 = vadd.f32 %v2942_v57, %v4181_v47  ;;  %3143 = vtanh.f32 %v1549_v41 }
 0x579   :  { %v3132_v50 = vpop.eup %3131  ;;  %v1551_v0 = vpop.f32.mrf.mxu0 }
 0x57a   :  { %v3134_v14 = vpop.eup %3133  ;;  %v1552_v54 = vadd.f32 %v1551_v0, %v4181_v47  ;;  %v1595_v5 = vpack.c.bf16 %v3132_v50, %v3128_v59  ;;  %3145 = vtanh.f32 %v1560_v60 }
 0x57b   :  { %v1596_v53 = vpack.c.bf16 %v3130_v58, %v3134_v14  ;;  %v2945_v8 = vpop.f32.mrf.mxu0 }
 0x57c   :  { %3147 = vtanh.f32 %v1552_v54  ;;  %2951 = vmatprep.mubr.msk.bf16.mxu1 %vm1303_vm1, %v1595_v5  ;;  %v1573_v7 = vadd.f32 %v2945_v8, %v4181_v47 }
 0x57d   :  { %3149 = vtanh.f32 %v1557_v62  ;;  %v1564_v11 = vpop.f32.mrf.mxu0  ;;  %2952 = vmatmul.mubr.msk.bf16.vlgmr.msra.gmra.mxu1 %vm1303_vm1, %v1596_v53  ;;  %v3136_v24 = vpop.eup %3135 }
 0x57e   :  { %v1565_v13 = vadd.f32 %v1564_v11, %v4181_v47  ;;  %2000 = vmatpush1.bf16.msra.mxu1 %v3057_v49 }
 0x57f   :  { %v2946_v56 = vpop.f32.mrf.mxu0  ;;  %v3138_v17 = vpop.eup %3137 }
 0x580   :  { %v1576_v16 = vadd.f32 %v2946_v56, %v4181_v47  ;;  %3151 = vtanh.f32 %v1565_v13 }
 0x581   :  { %v3140_v19 = vpop.eup %3139  ;;  %v1567_v4 = vpop.f32.mrf.mxu0 }
 0x582   :  { %v3142_v10 = vpop.eup %3141  ;;  %v1568_v12 = vadd.f32 %v1567_v4, %v4181_v47  ;;  %v1597_v27 = vpack.c.bf16 %v3140_v19, %v3136_v24  ;;  %3153 = vtanh.f32 %v1576_v16 }
 0x583   :  { %v1598_v63 = vpack.c.bf16 %v3138_v17, %v3142_v10 }
 0x584   :  { %3155 = vtanh.f32 %v1568_v12  ;;  %2955 = vmatprep.mubr.msk.bf16.mxu1 %vm1303_vm1, %v1597_v27 }
 0x585   :  { %3157 = vtanh.f32 %v1573_v7  ;;  %2956 = vmatmul.mubr.msk.bf16.gmra.mxu1 %vm1303_vm1, %v1598_v63  ;;  %v3144_v26 = vpop.eup %3143 }
 0x587   :  { %v3146_v28 = vpop.eup %3145 }
 0x589   :  { %v3148_v29 = vpop.eup %3147 }
 0x58a   :  { %v3150_v30 = vpop.eup %3149  ;;  %v1599_v22 = vpack.c.bf16 %v3148_v29, %v3144_v26 }
 0x58b   :  { %v1600_v36 = vpack.c.bf16 %v3146_v28, %v3150_v30 }
 0x58c   :  { %2959 = vmatprep.mubr.msk.bf16.mxu1 %vm1303_vm1, %v1599_v22 }
 0x58d   :  { %2960 = vmatmul.mubr.msk.bf16.gmra.mxu1 %vm1303_vm1, %v1600_v36  ;;  %v3152_v47 = vpop.eup %3151 }
 0x58f   :  { %v3154_v39 = vpop.eup %3153 }
 0x591   :  { %v3156_v38 = vpop.eup %3155 }
 0x592   :  { %v3158_v40 = vpop.eup %3157  ;;  %v1601_v43 = vpack.c.bf16 %v3156_v38, %v3152_v47 }
 0x593   :  { %v1602_v46 = vpack.c.bf16 %v3154_v39, %v3158_v40 }
 0x594   :  { %2963 = vmatprep.mubr.msk.bf16.mxu1 %vm1303_vm1, %v1601_v43 }
 0x595   :  { %2964 = vmatmul.mubr.msk.bf16.gmra.mxu1 %vm1303_vm1, %v1602_v46 }
 0x63d   :  { %v2953_v41 = vpop.f32.mrf.mxu1 }
 0x63e   :  { %v1679_v50 = vadd.f32 %v2953_v41, %v4195_v34 }
 0x63f   :  { %v1670_v59 = vpop.f32.mrf.mxu1 }
 0x640   :  { %v1671_v57 = vadd.f32 %v1670_v59, %v4195_v34 }
 0x641   :  { %v2954_v58 = vpop.f32.mrf.mxu1 }
 0x642   :  { %v1682_v60 = vadd.f32 %v2954_v58, %v4195_v34  ;;  %3159 = vtanh.f32 %v1671_v57 }
 0x643   :  { %v1673_v62 = vpop.f32.mrf.mxu1 }
 0x644   :  { %v1674_v0 = vadd.f32 %v1673_v62, %v4195_v34  ;;  %3161 = vtanh.f32 %v1682_v60 }
 0x645   :  { %v2957_v14 = vpop.f32.mrf.mxu1 }
 0x646   :  { %3163 = vtanh.f32 %v1674_v0  ;;  %v1695_v11 = vadd.f32 %v2957_v14, %v4195_v34 }
 0x647   :  { %3165 = vtanh.f32 %v1679_v50  ;;  %v1686_v54 = vpop.f32.mrf.mxu1 }
 0x648   :  { %v1687_v5 = vadd.f32 %v1686_v54, %v4195_v34 }
 0x649   :  { %v2958_v53 = vpop.f32.mrf.mxu1 }
 0x64a   :  { %v1698_v8 = vadd.f32 %v2958_v53, %v4195_v34  ;;  %3167 = vtanh.f32 %v1687_v5 }
 0x64b   :  { %v1689_v13 = vpop.f32.mrf.mxu1 }
 0x64c   :  { %v1690_v24 = vadd.f32 %v1689_v13, %v4195_v34  ;;  %3169 = vtanh.f32 %v1698_v8 }
 0x64d   :  { %v2961_v56 = vpop.f32.mrf.mxu1 }
 0x64e   :  { %3171 = vtanh.f32 %v1690_v24  ;;  %v1711_v27 = vadd.f32 %v2961_v56, %v4195_v34  ;;  %v3060_v24 = vld [vmem:[#allocation16] ss:$8 sps:$4 sm:$0xff]   ;;  %v3062_v56 = vld [vmem:[#allocation16 + $0x4] ss:$8 sps:$4 sm:$0xff]  }
 0x64f   :  { %3173 = vtanh.f32 %v1695_v11  ;;  %v1702_v17 = vpop.f32.mrf.mxu1  ;;  %v3160_v19 = vpop.eup %3159  ;;  %2001 = vmatprep.subr.bf16.mxu1 %v3062_v56 }
 0x650   :  { %v1703_v16 = vadd.f32 %v1702_v17, %v4195_v34  ;;  %2002 = vmatpush1.bf16.msra.mxu1 %v3060_v24  ;;  %v3568_v17 = vmov 0  }
 0x651   :  { %v2962_v7 = vpop.f32.mrf.mxu1  ;;  %v3162_v4 = vpop.eup %3161  ;;  %2019 = vmatprep.mubr.bf16.mxu1 %v3568_v17 }
 0x652   :  { %v1714_v10 = vadd.f32 %v2962_v7, %v4195_v34  ;;  %3175 = vtanh.f32 %v1703_v16  ;;  %v4261_v16 = vpop.permute.xlu0 %1763 }
 0x653   :  { %v3164_v12 = vpop.eup %3163  ;;  %v1705_v63 = vpop.f32.mrf.mxu1 }
 0x654   :  { %v3166_v26 = vpop.eup %3165  ;;  %v1706_v28 = vadd.f32 %v1705_v63, %v4195_v34  ;;  %v1749_v29 = vpack.c.bf16 %v3164_v12, %v3160_v19  ;;  %3177 = vtanh.f32 %v1714_v10 }
 0x655   :  { %v1750_v30 = vpack.c.bf16 %v3162_v4, %v3166_v26  ;;  %v2965_v22 = vpop.f32.mrf.mxu1 }
 0x656   :  { %3179 = vtanh.f32 %v1706_v28  ;;  %2971 = vmatprep.mubr.msk.bf16.mxu0 %vm1303_vm1, %v1749_v29  ;;  %v1727_v49 = vadd.f32 %v2965_v22, %v4195_v34 }
 0x657   :  { %3181 = vtanh.f32 %v1711_v27  ;;  %v1718_v36 = vpop.f32.mrf.mxu1  ;;  %2972 = vmatmul.mubr.msk.bf16.vlgmr.msra.gmra.mxu0 %vm1303_vm1, %v1750_v30  ;;  %v3168_v39 = vpop.eup %3167 }
 0x658   :  { %v1719_v47 = vadd.f32 %v1718_v36, %v4195_v34 }
 0x659   :  { %v2966_v38 = vpop.f32.mrf.mxu1  ;;  %v3170_v40 = vpop.eup %3169 }
 0x65a   :  { %v1730_v43 = vadd.f32 %v2966_v38, %v4195_v34  ;;  %3183 = vtanh.f32 %v1719_v47 }
 0x65b   :  { %v3172_v46 = vpop.eup %3171  ;;  %v1721_v51 = vpop.f32.mrf.mxu1 }
 0x65c   :  { %v3174_v41 = vpop.eup %3173  ;;  %v1722_v59 = vadd.f32 %v1721_v51, %v4195_v34  ;;  %v1751_v57 = vpack.c.bf16 %v3172_v46, %v3168_v39  ;;  %3185 = vtanh.f32 %v1730_v43 }
 0x65d   :  { %v1752_v58 = vpack.c.bf16 %v3170_v40, %v3174_v41 }
 0x65e   :  { %3187 = vtanh.f32 %v1722_v59  ;;  %2975 = vmatprep.mubr.msk.bf16.mxu0 %vm1303_vm1, %v1751_v57 }
 0x65f   :  { %3189 = vtanh.f32 %v1727_v49  ;;  %2976 = vmatmul.mubr.msk.bf16.gmra.mxu0 %vm1303_vm1, %v1752_v58  ;;  %v3176_v60 = vpop.eup %3175 }
 0x661   :  { %v3178_v50 = vpop.eup %3177 }
 0x663   :  { %v3180_v62 = vpop.eup %3179 }
 0x664   :  { %v3182_v0 = vpop.eup %3181  ;;  %v1753_v14 = vpack.c.bf16 %v3180_v62, %v3176_v60 }
 0x665   :  { %v1754_v54 = vpack.c.bf16 %v3178_v50, %v3182_v0 }
 0x666   :  { %2979 = vmatprep.mubr.msk.bf16.mxu0 %vm1303_vm1, %v1753_v14 }
 0x667   :  { %2980 = vmatmul.mubr.msk.bf16.gmra.mxu0 %vm1303_vm1, %v1754_v54  ;;  %v3184_v34 = vpop.eup %3183 }
 0x669   :  { %v3186_v5 = vpop.eup %3185 }
 0x66b   :  { %v3188_v53 = vpop.eup %3187 }
 0x66c   :  { %v3190_v8 = vpop.eup %3189  ;;  %v1755_v11 = vpack.c.bf16 %v3188_v53, %v3184_v34 }
 0x66d   :  { %v1756_v13 = vpack.c.bf16 %v3186_v5, %v3190_v8 }
 0x66e   :  { %2983 = vmatprep.mubr.msk.bf16.mxu0 %vm1303_vm1, %v1755_v11 }
 0x66f   :  { %2984 = vmatmul.mubr.msk.bf16.gmra.mxu0 %vm1303_vm1, %v1756_v13 }
 0x717   :  { %v2973_v19 = vpop.f32.mrf.mxu0 }
 0x718   :  { %v1833_v7 = vadd.f32 %v2973_v19, %v4261_v16 }
 0x719   :  { %v1824_v4 = vpop.f32.mrf.mxu0 }
 0x71a   :  { %3191 = vtanh.f32 %v1833_v7  ;;  %v1825_v10 = vadd.f32 %v1824_v4, %v4261_v16 }
 0x71b   :  { %v2974_v12 = vpop.f32.mrf.mxu0 }
 0x71c   :  { %3193 = vtanh.f32 %v1825_v10  ;;  %v1836_v27 = vadd.f32 %v2974_v12, %v4261_v16 }
 0x71d   :  { %v1827_v63 = vpop.f32.mrf.mxu0 }
 0x71e   :  { %3195 = vtanh.f32 %v1836_v27  ;;  %v1828_v26 = vadd.f32 %v1827_v63, %v4261_v16 }
 0x71f   :  { %v2977_v28 = vpop.f32.mrf.mxu0 }
 0x720   :  { %3197 = vtanh.f32 %v1828_v26  ;;  %v1849_v29 = vadd.f32 %v2977_v28, %v4261_v16 }
 0x721   :  { %v1840_v30 = vpop.f32.mrf.mxu0 }
 0x722   :  { %3199 = vtanh.f32 %v1849_v29  ;;  %v1841_v22 = vadd.f32 %v1840_v30, %v4261_v16 }
 0x723   :  { %v2978_v36 = vpop.f32.mrf.mxu0 }
 0x724   :  { %v1852_v47 = vadd.f32 %v2978_v36, %v4261_v16  ;;  %3201 = vtanh.f32 %v1841_v22 }
 0x725   :  { %v1843_v39 = vpop.f32.mrf.mxu0 }
 0x726   :  { %3203 = vtanh.f32 %v1852_v47  ;;  %v1844_v38 = vadd.f32 %v1843_v39, %v4261_v16 }
 0x727   :  { %v3192_v40 = vpop.eup %3191  ;;  %v2981_v43 = vpop.f32.mrf.mxu0 }
 0x728   :  { %3205 = vtanh.f32 %v1844_v38  ;;  %v1865_v46 = vadd.f32 %v2981_v43, %v4261_v16  ;;  %v1905_v49 = vadd.f32 %v3192_v40, %v4091_v45 }
 0x729   :  { %v3194_v51 = vpop.eup %3193  ;;  %v1856_v41 = vpop.f32.mrf.mxu0 }
 0x72a   :  { %3207 = vtanh.f32 %v1865_v46  ;;  %v1857_v59 = vadd.f32 %v1856_v41, %v4261_v16  ;;  %2360 = vrot.lane.b32.xlu1 %v1905_v49, %s3567_s11  ;;  %v1903_v57 = vadd.f32 %v3194_v51, %v4077_v31 }
 0x72b   :  { %v3196_v58 = vpop.eup %3195  ;;  %v2982_v60 = vpop.f32.mrf.mxu0 }
 0x72c   :  { %v1868_v50 = vadd.f32 %v2982_v60, %v4261_v16  ;;  %2356 = vrot.lane.b32.xlu0 %v1903_v57, %s3567_s11  ;;  %3209 = vtanh.f32 %v1857_v59  ;;  %v1906_v34 = vadd.f32 %v3196_v58, %v4094_v9 }
 0x72d   :  { %v3198_v62 = vpop.eup %3197  ;;  %v1859_v0 = vpop.f32.mrf.mxu0 }
 0x72e   :  { %3211 = vtanh.f32 %v1868_v50  ;;  %v1860_v14 = vadd.f32 %v1859_v0, %v4261_v16  ;;  %v1904_v54 = vadd.f32 %v3198_v62, %v4080_v35  ;;  %v1924_v30 = vpack.c.bf16 %v1906_v34, %v1905_v49 }
 0x72f   :  { %v3200_v5 = vpop.eup %3199  ;;  %v2985_v53 = vpop.f32.mrf.mxu0 }
 0x730   :  { %3213 = vtanh.f32 %v1860_v14  ;;  %v1881_v8 = vadd.f32 %v2985_v53, %v4261_v16  ;;  %2358 = vrot.lane.b32.xlu1 %v1904_v54, %s3567_s11  ;;  %v1923_v11 = vpack.c.bf16 %v1904_v54, %v1903_v57  ;;  %2362 = vrot.lane.b32.xlu0 %v1906_v34, %s3567_s11  ;;  %v1909_v19 = vadd.f32 %v3200_v5, %v4121_v25  ;;  %v2421_v5 = vpop.permute.xlu1 %2420 }
 0x731   :  { %v1872_v13 = vpop.f32.mrf.mxu0  ;;  %v3202_v24 = vpop.eup %3201 }
 0x732   :  { %3215 = vtanh.f32 %v1881_v8  ;;  %v1873_v56 = vadd.f32 %v1872_v13, %v4261_v16  ;;  %2675 = vmatmul.mubr.msk.bf16.vlgmr.msra.gmra.mxu1 %vm1303_vm1, %v1923_v11  ;;  %v1907_v28 = vadd.f32 %v3202_v24, %v4106_v6  ;;  %v2423_v8 = vpop.permute.xlu0 %2422 }
 0x733   :  { %v3204_v7 = vpop.eup %3203  ;;  %v2986_v4 = vpop.f32.mrf.mxu0  ;;  %2029 = vmatprep.mubr.bf16.mxu1 %v3568_v17 }
 0x734   :  { %v1884_v10 = vadd.f32 %v2986_v4, %v4261_v16  ;;  %2368 = vrot.lane.b32.xlu1 %v1909_v19, %s3567_s11  ;;  %v1910_v12 = vadd.f32 %v3204_v7, %v4124_v3  ;;  %3217 = vtanh.f32 %v1873_v56  ;;  %v2425_v53 = vpop.permute.xlu1 %2424 }
 0x735   :  { %v3206_v27 = vpop.eup %3205  ;;  %v1875_v63 = vpop.f32.mrf.mxu0 }
 0x736   :  { %3219 = vtanh.f32 %v1884_v10  ;;  %v1876_v26 = vadd.f32 %v1875_v63, %v4261_v16  ;;  %2370 = vrot.lane.b32.xlu0 %v1910_v12, %s3567_s11  ;;  %v1908_v22 = vadd.f32 %v3206_v27, %v4109_v55  ;;  %v1926_v50 = vpack.c.bf16 %v1910_v12, %v1909_v19  ;;  %v2427_v13 = vpop.permute.xlu0 %2426 }
 0x737   :  { %v3208_v29 = vpop.eup %3207 }
 0x738   :  { %3221 = vtanh.f32 %v1876_v26  ;;  %2364 = vrot.lane.b32.xlu1 %v1907_v28, %s3567_s11  ;;  %v1913_v47 = vadd.f32 %v3208_v29, %v4151_v20  ;;  %v1925_v46 = vpack.c.bf16 %v1908_v22, %v1907_v28  ;;  %v2429_v11 = vpop.permute.xlu1 %2428 }
 0x739   :  { %v3210_v36 = vpop.eup %3209 }
 0x73a   :  { %2366 = vrot.lane.b32.xlu0 %v1908_v22, %s3567_s11  ;;  %2676 = vmatmul.mubr.msk.bf16.gmra.mxu1 %vm1303_vm1, %v1924_v30  ;;  %v1911_v40 = vadd.f32 %v3210_v36, %v4136_v21  ;;  %v2431_v56 = vpop.permute.xlu0 %2430 }
 0x73b   :  { %v3212_v39 = vpop.eup %3211  ;;  %2039 = vmatprep.mubr.bf16.mxu1 %v3568_v17 }
 0x73c   :  { %2376 = vrot.lane.b32.xlu1 %v1913_v47, %s3567_s11  ;;  %v1914_v16 = vadd.f32 %v3212_v39, %v4154_v23  ;;  %v2433_v24 = vpop.permute.xlu1 %2432 }
 0x73d   :  { %v3214_v38 = vpop.eup %3213 }
 0x73e   :  { %2378 = vrot.lane.b32.xlu0 %v1914_v16, %s3567_s11  ;;  %v1912_v49 = vadd.f32 %v3214_v38, %v4139_v15  ;;  %v1928_v14 = vpack.c.bf16 %v1914_v16, %v1913_v47  ;;  %v2435_v7 = vpop.permute.xlu0 %2434 }
 0x73f   :  { %v3216_v43 = vpop.eup %3215 }
 0x740   :  { %2372 = vrot.lane.b32.xlu1 %v1911_v40, %s3567_s11  ;;  %v1917_v41 = vadd.f32 %v3216_v43, %v4175_v44  ;;  %v1927_v0 = vpack.c.bf16 %v1912_v49, %v1911_v40  ;;  %v2437_v19 = vpop.permute.xlu1 %2436 }
 0x741   :  { %v3218_v51 = vpop.eup %3217 }
 0x742   :  { %2374 = vrot.lane.b32.xlu0 %v1912_v49, %s3567_s11  ;;  %2677 = vmatmul.mubr.msk.bf16.gmra.mxu1 %vm1303_vm1, %v1925_v46  ;;  %v1915_v60 = vadd.f32 %v3218_v51, %v4166_v18 }
 0x743   :  { %v3220_v59 = vpop.eup %3219  ;;  %2049 = vmatprep.mubr.bf16.mxu1 %v3568_v17 }
 0x744   :  { %2384 = vrot.lane.b32.xlu1 %v1917_v41, %s3567_s11  ;;  %v1918_v57 = vadd.f32 %v3220_v59, %v4178_v1 }
 0x745   :  { %v3222_v58 = vpop.eup %3221 }
 0x746   :  { %2386 = vrot.lane.b32.xlu0 %v1918_v57, %s3567_s11  ;;  %v1916_v62 = vadd.f32 %v3222_v58, %v4169_v33  ;;  %v1930_v34 = vpack.c.bf16 %v1918_v57, %v1917_v41 }
 0x748   :  { %2380 = vrot.lane.b32.xlu1 %v1915_v60, %s3567_s11  ;;  %v1929_v54 = vpack.c.bf16 %v1916_v62, %v1915_v60 }
 0x74a   :  { %2382 = vrot.lane.b32.xlu0 %v1916_v62, %s3567_s11  ;;  %2678 = vmatmul.mubr.msk.bf16.gmra.mxu1 %vm1303_vm1, %v1926_v50 }
 0x74b   :  { %2059 = vmatprep.mubr.bf16.mxu1 %v3568_v17 }
 0x752   :  { %2679 = vmatmul.mubr.msk.bf16.gmra.mxu1 %vm1303_vm1, %v1927_v0 }
 0x753   :  { %2069 = vmatprep.mubr.bf16.mxu1 %v3568_v17 }
 0x75a   :  { %2680 = vmatmul.mubr.msk.bf16.gmra.mxu1 %vm1303_vm1, %v1928_v14 }
 0x75b   :  { %2079 = vmatprep.mubr.bf16.mxu1 %v3568_v17 }
 0x762   :  { %2681 = vmatmul.mubr.msk.bf16.gmra.mxu1 %vm1303_vm1, %v1929_v54 }
 0x763   :  { %2089 = vmatprep.mubr.bf16.mxu1 %v3568_v17 }
 0x76a   :  { %2682 = vmatmul.mubr.msk.bf16.gmra.mxu1 %vm1303_vm1, %v1930_v34 }
 0x79c   :  { %v2361_v4 = vpop.permute.xlu1 %2360 }
 0x79d   :  { %v2470_v10 = vsel %vm1303_vm1, %v4091_v45, %v2361_v4 }
 0x79e   :  { %v2486_v12 = vsel %vm726_vm0, %v2470_v10, %v2425_v53  ;;  %v2357_v27 = vpop.permute.xlu0 %2356 }
 0x79f   :  { %2502 = vst [vmem:[#allocation17 + $0x10] sm:$0xff] %v2486_v12  ;;  %v2468_v17 = vsel %vm1303_vm1, %v4077_v31, %v2357_v27 }
 0x7a0   :  { %v2484_v63 = vsel %vm726_vm0, %v2468_v17, %v2421_v5 }
 0x7a1   :  { %2500 = vst [vmem:[#allocation17] sm:$0xff] %v2484_v63 }
 0x7a2   :  { %v2359_v26 = vpop.permute.xlu1 %2358  ;;  %v2363_v28 = vpop.permute.xlu0 %2362 }
 0x7a3   :  { %v2469_v29 = vsel %vm1303_vm1, %v4080_v35, %v2359_v26  ;;  %v2471_v30 = vsel %vm1303_vm1, %v4094_v9, %v2363_v28 }
 0x7a4   :  { %v2485_v45 = vsel %vm726_vm0, %v2469_v29, %v2423_v8  ;;  %v2487_v22 = vsel %vm726_vm0, %v2471_v30, %v2427_v13 }
 0x7a5   :  { %2501 = vst [vmem:[#allocation17 + $0x8] sm:$0xff] %v2485_v45  ;;  %2503 = vst [vmem:[#allocation17 + $0x18] sm:$0xff] %v2487_v22 }
 0x7a6   :  { %v2369_v36 = vpop.permute.xlu1 %2368 }
 0x7a7   :  { %v2474_v31 = vsel %vm1303_vm1, %v4121_v25, %v2369_v36 }
 0x7a8   :  { %v2490_v47 = vsel %vm726_vm0, %v2474_v31, %v2433_v24  ;;  %v2371_v39 = vpop.permute.xlu0 %2370 }
 0x7a9   :  { %2506 = vst [vmem:[#allocation17 + $0x30] sm:$0xff] %v2490_v47  ;;  %v2475_v35 = vsel %vm1303_vm1, %v4124_v3, %v2371_v39 }
 0x7aa   :  { %v2491_v16 = vsel %vm726_vm0, %v2475_v35, %v2435_v7  ;;  %v2365_v9 = vpop.permute.xlu1 %2364 }
 0x7ab   :  { %2507 = vst [vmem:[#allocation17 + $0x38] sm:$0xff] %v2491_v16  ;;  %v2472_v38 = vsel %vm1303_vm1, %v4106_v6, %v2365_v9  ;;  %v1933_v6 = vlaneseq }
 0x7ac   :  { %v2488_v40 = vsel %vm726_vm0, %v2472_v38, %v2429_v11  ;;  %v2367_v43 = vpop.permute.xlu0 %2366 }
 0x7ad   :  { %2504 = vst [vmem:[#allocation17 + $0x20] sm:$0xff] %v2488_v40  ;;  %v2473_v25 = vsel %vm1303_vm1, %v4109_v55, %v2367_v43  ;;  %v1934_v59 = vshrl.u32 %v1933_v6, 7  ;;  %v1931_v55 = vld [vmem:[%s4726_s13] sm:$0x3]  ;;  %s3569_s13 = smov [#allocation17]  }
 0x7ae   :  { %v2489_v46 = vsel %vm726_vm0, %v2473_v25, %v2431_v56  ;;  %v4350_v49 = vpop.permute.xlu1 %2376 }
 0x7af   :  { %2505 = vst [vmem:[#allocation17 + $0x28] sm:$0xff] %v2489_v46  ;;  %v1935_v57 = vsub.s32 0, %v1934_v59  ;;  %v1939_v58 = vsub.s32 1, %v1934_v59 }
 0x7b1   :  { %v4358_v60 = vrot.slane %v1931_v55, %v1935_v57  ;;  %v4360_v50 = vrot.slane %v1931_v55, %v1939_v58 }
 0x7b2   :  { %v2373_v3 = vpop.permute.xlu1 %2372 }
 0x7b3   :  { %v2476_v51 = vsel %vm1303_vm1, %v4136_v21, %v2373_v3 }
 0x7b4   :  { %v2492_v41 = vsel %vm726_vm0, %v2476_v51, %v2437_v19 }
 0x7b5   :  { %2508 = vst [vmem:[#allocation17 + $0x40] sm:$0xff] %v2492_v41 }
 0x7f2   :  { %v2021_v62 = vpop.f32.mrf.mxu1 }
 0x7f3   :  { %v4363_v14 = vadd.f32 %v2021_v62, %v4358_v60 }
 0x7f4   :  { %v2023_v0 = vpop.f32.mrf.mxu1 }
 0x7f5   :  { %v4366_v21 = vadd.f32 %v2023_v0, %v4360_v50 }
 0x7f6   :  { %v2025_v54 = vpop.f32.mrf.mxu1 }
 0x7f7   :  { %v2100_v34 = vmax.f32 %v4363_v14, %v4366_v21  ;;  %v4371_v53 = vadd.f32 %v2025_v54, %v4358_v60 }
 0x7f8   :  { %v2027_v5 = vpop.f32.mrf.mxu1 }
 0x7f9   :  { %v4374_v8 = vadd.f32 %v2027_v5, %v4360_v50  ;;  %2101 = vmax.xlane.f32.xlu1 %v2100_v34 }
 0x7fa   :  { %v2031_v11 = vpop.f32.mrf.mxu1 }
 0x7fb   :  { %v2103_v13 = vmax.f32 %v4371_v53, %v4374_v8  ;;  %v4379_v56 = vadd.f32 %v2031_v11, %v4358_v60 }
 0x7fc   :  { %v2033_v24 = vpop.f32.mrf.mxu1 }
 0x7fd   :  { %v4382_v19 = vadd.f32 %v2033_v24, %v4360_v50  ;;  %2104 = vmax.xlane.f32.xlu0 %v2103_v13 }
 0x7fe   :  { %v2035_v7 = vpop.f32.mrf.mxu1 }
 0x7ff   :  { %v2106_v4 = vmax.f32 %v4379_v56, %v4382_v19  ;;  %v4387_v12 = vadd.f32 %v2035_v7, %v4358_v60 }
 0x800   :  { %v2037_v10 = vpop.f32.mrf.mxu1 }
 0x801   :  { %v4390_v27 = vadd.f32 %v2037_v10, %v4360_v50  ;;  %2107 = vmax.xlane.f32.xlu0 %v2106_v4 }
 0x802   :  { %v2041_v17 = vpop.f32.mrf.mxu1 }
 0x803   :  { %v2109_v63 = vmax.f32 %v4387_v12, %v4390_v27  ;;  %v4395_v28 = vadd.f32 %v2041_v17, %v4358_v60 }
 0x804   :  { %v2043_v26 = vpop.f32.mrf.mxu1 }
 0x805   :  { %v4398_v29 = vadd.f32 %v2043_v26, %v4360_v50  ;;  %2110 = vmax.xlane.f32.xlu1 %v2109_v63 }
 0x806   :  { %v2045_v30 = vpop.f32.mrf.mxu1 }
 0x807   :  { %v2112_v45 = vmax.f32 %v4395_v28, %v4398_v29  ;;  %v4403_v36 = vadd.f32 %v2045_v30, %v4358_v60 }
 0x808   :  { %v2047_v22 = vpop.f32.mrf.mxu1 }
 0x809   :  { %v4406_v31 = vadd.f32 %v2047_v22, %v4360_v50  ;;  %2113 = vmax.xlane.f32.xlu0 %v2112_v45 }
 0x80a   :  { %v2051_v47 = vpop.f32.mrf.mxu1 }
 0x80b   :  { %v2115_v39 = vmax.f32 %v4403_v36, %v4406_v31  ;;  %v4411_v16 = vadd.f32 %v2051_v47, %v4358_v60 }
 0x80c   :  { %v2053_v35 = vpop.f32.mrf.mxu1 }
 0x80d   :  { %v4414_v9 = vadd.f32 %v2053_v35, %v4360_v50  ;;  %2116 = vmax.xlane.f32.xlu1 %v2115_v39 }
 0x80e   :  { %v2055_v38 = vpop.f32.mrf.mxu1 }
 0x80f   :  { %v2118_v40 = vmax.f32 %v4411_v16, %v4414_v9  ;;  %v4419_v25 = vadd.f32 %v2055_v38, %v4358_v60 }
 0x810   :  { %v2057_v43 = vpop.f32.mrf.mxu1 }
 0x811   :  { %v4422_v46 = vadd.f32 %v2057_v43, %v4360_v50  ;;  %2119 = vmax.xlane.f32.xlu0 %v2118_v40 }
 0x812   :  { %v2061_v3 = vpop.f32.mrf.mxu1 }
 0x813   :  { %v2121_v51 = vmax.f32 %v4419_v25, %v4422_v46  ;;  %v4427_v6 = vadd.f32 %v2061_v3, %v4358_v60 }
 0x814   :  { %v2063_v41 = vpop.f32.mrf.mxu1 }
 0x815   :  { %v4430_v59 = vadd.f32 %v2063_v41, %v4360_v50  ;;  %2122 = vmax.xlane.f32.xlu1 %v2121_v51 }
 0x816   :  { %v2065_v57 = vpop.f32.mrf.mxu1 }
 0x817   :  { %v2124_v58 = vmax.f32 %v4427_v6, %v4430_v59  ;;  %v4435_v62 = vadd.f32 %v2065_v57, %v4358_v60 }
 0x818   :  { %v2067_v55 = vpop.f32.mrf.mxu1 }
 0x819   :  { %v4438_v0 = vadd.f32 %v2067_v55, %v4360_v50  ;;  %2125 = vmax.xlane.f32.xlu0 %v2124_v58 }
 0x81a   :  { %v2071_v54 = vpop.f32.mrf.mxu1 }
 0x81b   :  { %v2127_v34 = vmax.f32 %v4435_v62, %v4438_v0  ;;  %v4443_v11 = vadd.f32 %v2071_v54, %v4358_v60 }
 0x81c   :  { %v2073_v5 = vpop.f32.mrf.mxu1 }
 0x81d   :  { %v4446_v13 = vadd.f32 %v2073_v5, %v4360_v50  ;;  %2128 = vmax.xlane.f32.xlu1 %v2127_v34 }
 0x81e   :  { %v2075_v24 = vpop.f32.mrf.mxu1 }
 0x81f   :  { %v2130_v7 = vmax.f32 %v4443_v11, %v4446_v13  ;;  %v4451_v10 = vadd.f32 %v2075_v24, %v4358_v60  ;;  %v4498_v24 = vpop.permute.xlu0 %2378 }
 0x820   :  { %v2077_v4 = vpop.f32.mrf.mxu1 }
 0x821   :  { %v4454_v17 = vadd.f32 %v2077_v4, %v4360_v50  ;;  %2131 = vmax.xlane.f32.xlu0 %v2130_v7 }
 0x822   :  { %v2081_v63 = vpop.f32.mrf.mxu1 }
 0x823   :  { %v2133_v26 = vmax.f32 %v4451_v10, %v4454_v17  ;;  %v4459_v45 = vadd.f32 %v2081_v63, %v4358_v60 }
 0x824   :  { %v2083_v30 = vpop.f32.mrf.mxu1 }
 0x825   :  { %v4462_v22 = vadd.f32 %v2083_v30, %v4360_v50  ;;  %2134 = vmax.xlane.f32.xlu1 %v2133_v26 }
 0x826   :  { %v2085_v47 = vpop.f32.mrf.mxu1 }
 0x827   :  { %v2136_v39 = vmax.f32 %v4459_v45, %v4462_v22  ;;  %v4467_v38 = vadd.f32 %v2085_v47, %v4358_v60 }
 0x828   :  { %v2087_v35 = vpop.f32.mrf.mxu1 }
 0x829   :  { %v4470_v40 = vadd.f32 %v2087_v35, %v4360_v50  ;;  %2137 = vmax.xlane.f32.xlu0 %v2136_v39 }
 0x82a   :  { %v2091_v43 = vpop.f32.mrf.mxu1 }
 0x82b   :  { %v2139_v3 = vmax.f32 %v4467_v38, %v4470_v40  ;;  %v4475_v41 = vadd.f32 %v2091_v43, %v4358_v60 }
 0x82c   :  { %v2093_v51 = vpop.f32.mrf.mxu1 }
 0x82d   :  { %v4478_v57 = vadd.f32 %v2093_v51, %v4360_v50  ;;  %2140 = vmax.xlane.f32.xlu1 %v2139_v3 }
 0x82e   :  { %v2095_v55 = vpop.f32.mrf.mxu1 }
 0x82f   :  { %v2142_v58 = vmax.f32 %v4475_v41, %v4478_v57  ;;  %v4494_v5 = vadd.f32 %v2095_v55, %v4358_v60 }
 0x830   :  { %v2097_v54 = vpop.f32.mrf.mxu1 }
 0x831   :  { %2143 = vmax.xlane.f32.xlu0 %v2142_v58  ;;  %v4491_v34 = vadd.f32 %v2097_v54, %v4360_v50 }
 0x83e   :  { %2440 = vrot.lane.b32.xlu1 %v3979_v32, %s3554_s21  ;;  %v2145_v32 = vmax.f32 %v4494_v5, %v4491_v34 }
 0x847   :  { %2438 = vrot.lane.b32.xlu0 %v3990_v42, %s3554_s21  ;;  %v4504_v42 = vpop.permute.xlu1 %2384 }
 0x84b   :  { %2442 = vrot.lane.b32.xlu0 %v3987_v37, %s3554_s21  ;;  %v4502_v37 = vpop.permute.xlu0 %2374  ;;  %v4508_v50 = vpop.permute.xlu1 %2380 }
 0x84f   :  { %2446 = vrot.lane.b32.xlu0 %v4009_v2, %s3554_s21  ;;  %v4506_v2 = vpop.permute.xlu0 %2386 }
 0x853   :  { %v4510_v7 = vpop.permute.xlu0 %2382 }
 0x862   :  { %2146 = vmax.xlane.f32.xlu1 %v2145_v32 }
 0x873   :  { %2444 = vrot.lane.b32.xlu1 %v3999_v52, %s3554_s21 }
 0x882   :  { %v2102_v60 = vpop.xlane.xlu1 %2101 }
 0x883   :  { %v2148_v4 = vsub.f32 %v4363_v14, %v2102_v60  ;;  %v2149_v63 = vsub.f32 %v4366_v21, %v2102_v60 }
 0x885   :  { %v2180_v26 = vmul.f32 1.442695, %v2148_v4  ;;  %v2182_v30 = vmul.f32 1.442695, %v2149_v63 }
 0x886   :  { %v2105_v47 = vpop.xlane.xlu0 %2104 }
 0x887   :  { %3223 = vpow2.f32 %v2180_v26  ;;  %v2150_v52 = vsub.f32 %v4371_v53, %v2105_v47  ;;  %v2151_v39 = vsub.f32 %v4374_v8, %v2105_v47 }
 0x888   :  { %3225 = vpow2.f32 %v2182_v30 }
 0x889   :  { %v2184_v35 = vmul.f32 1.442695, %v2150_v52  ;;  %v2186_v43 = vmul.f32 1.442695, %v2151_v39 }
 0x88a   :  { %v2108_v3 = vpop.xlane.xlu0 %2107 }
 0x88b   :  { %3227 = vpow2.f32 %v2184_v35  ;;  %v2152_v51 = vsub.f32 %v4379_v56, %v2108_v3  ;;  %v2153_v58 = vsub.f32 %v4382_v19, %v2108_v3 }
 0x88c   :  { %3229 = vpow2.f32 %v2186_v43 }
 0x88d   :  { %v2188_v14 = vmul.f32 1.442695, %v2152_v51  ;;  %v2190_v21 = vmul.f32 1.442695, %v2153_v58 }
 0x88e   :  { %v2111_v55 = vpop.xlane.xlu1 %2110 }
 0x88f   :  { %3231 = vpow2.f32 %v2188_v14  ;;  %v2154_v54 = vsub.f32 %v4387_v12, %v2111_v55  ;;  %v2155_v53 = vsub.f32 %v4390_v27, %v2111_v55 }
 0x890   :  { %3233 = vpow2.f32 %v2190_v21 }
 0x891   :  { %v2192_v8 = vmul.f32 1.442695, %v2154_v54  ;;  %v2194_v32 = vmul.f32 1.442695, %v2155_v53 }
 0x892   :  { %v2114_v60 = vpop.xlane.xlu0 %2113 }
 0x893   :  { %3235 = vpow2.f32 %v2192_v8  ;;  %v2156_v4 = vsub.f32 %v4395_v28, %v2114_v60  ;;  %v2157_v56 = vsub.f32 %v4398_v29, %v2114_v60 }
 0x894   :  { %v4522_v63 = vpop.eup %3223  ;;  %3237 = vpow2.f32 %v2194_v32 }
 0x895   :  { %v4524_v19 = vpop.eup %3225  ;;  %v2196_v26 = vmul.f32 1.442695, %v2156_v4  ;;  %v2198_v30 = vmul.f32 1.442695, %v2157_v56 }
 0x896   :  { %v2117_v47 = vpop.xlane.xlu1 %2116  ;;  %v2244_v12 = vadd.f32 %v4524_v19, %v4522_v63 }
 0x897   :  { %3239 = vpow2.f32 %v2196_v26  ;;  %v2158_v27 = vsub.f32 %v4403_v36, %v2117_v47  ;;  %v2159_v52 = vsub.f32 %v4406_v31, %v2117_v47 }
 0x898   :  { %v4530_v39 = vpop.eup %3227  ;;  %3241 = vpow2.f32 %v2198_v30  ;;  %2245 = vadd.xlane.f32.xlu0 %v2244_v12 }
 0x899   :  { %v4532_v28 = vpop.eup %3229  ;;  %v2200_v29 = vmul.f32 1.442695, %v2158_v27  ;;  %v2202_v35 = vmul.f32 1.442695, %v2159_v52 }
 0x89a   :  { %v2120_v43 = vpop.xlane.xlu0 %2119  ;;  %v2247_v3 = vadd.f32 %v4532_v28, %v4530_v39 }
 0x89b   :  { %3243 = vpow2.f32 %v2200_v29  ;;  %v2160_v51 = vsub.f32 %v4411_v16, %v2120_v43  ;;  %v2161_v58 = vsub.f32 %v4414_v9, %v2120_v43 }
 0x89c   :  { %v4538_v36 = vpop.eup %3231  ;;  %3245 = vpow2.f32 %v2202_v35  ;;  %2248 = vadd.xlane.f32.xlu1 %v2247_v3 }
 0x89d   :  { %v4540_v31 = vpop.eup %3233  ;;  %v2204_v14 = vmul.f32 1.442695, %v2160_v51  ;;  %v2206_v21 = vmul.f32 1.442695, %v2161_v58 }
 0x89e   :  { %v2123_v55 = vpop.xlane.xlu1 %2122  ;;  %v2250_v54 = vadd.f32 %v4540_v31, %v4538_v36 }
 0x89f   :  { %3247 = vpow2.f32 %v2204_v14  ;;  %v2162_v53 = vsub.f32 %v4419_v25, %v2123_v55  ;;  %v2163_v8 = vsub.f32 %v4422_v46, %v2123_v55 }
 0x8a0   :  { %v4546_v16 = vpop.eup %3235  ;;  %3249 = vpow2.f32 %v2206_v21  ;;  %2251 = vadd.xlane.f32.xlu0 %v2250_v54 }
 0x8a1   :  { %v4548_v9 = vpop.eup %3237  ;;  %v2208_v32 = vmul.f32 1.442695, %v2162_v53  ;;  %v2210_v60 = vmul.f32 1.442695, %v2163_v8 }
 0x8a2   :  { %v2126_v4 = vpop.xlane.xlu0 %2125  ;;  %v2253_v56 = vadd.f32 %v4548_v9, %v4546_v16 }
 0x8a3   :  { %3251 = vpow2.f32 %v2208_v32  ;;  %v2164_v26 = vsub.f32 %v4427_v6, %v2126_v4  ;;  %v2165_v30 = vsub.f32 %v4430_v59, %v2126_v4 }
 0x8a4   :  { %v4554_v25 = vpop.eup %3239  ;;  %3253 = vpow2.f32 %v2210_v60  ;;  %2254 = vadd.xlane.f32.xlu1 %v2253_v56 }
 0x8a5   :  { %v4556_v46 = vpop.eup %3241  ;;  %v2212_v47 = vmul.f32 1.442695, %v2164_v26  ;;  %v2214_v12 = vmul.f32 1.442695, %v2165_v30 }
 0x8a6   :  { %v2129_v27 = vpop.xlane.xlu1 %2128  ;;  %v2256_v52 = vadd.f32 %v4556_v46, %v4554_v25 }
 0x8a7   :  { %3255 = vpow2.f32 %v2212_v47  ;;  %v2166_v29 = vsub.f32 %v4435_v62, %v2129_v27  ;;  %v2167_v35 = vsub.f32 %v4438_v0, %v2129_v27 }
 0x8a8   :  { %v4562_v6 = vpop.eup %3243  ;;  %3257 = vpow2.f32 %v2214_v12  ;;  %2257 = vadd.xlane.f32.xlu0 %v2256_v52 }
 0x8a9   :  { %v4564_v59 = vpop.eup %3245  ;;  %v2216_v43 = vmul.f32 1.442695, %v2166_v29  ;;  %v2218_v3 = vmul.f32 1.442695, %v2167_v35 }
 0x8aa   :  { %v2132_v51 = vpop.xlane.xlu0 %2131  ;;  %v2259_v58 = vadd.f32 %v4564_v59, %v4562_v6 }
 0x8ab   :  { %3259 = vpow2.f32 %v2216_v43  ;;  %v2168_v14 = vsub.f32 %v4443_v11, %v2132_v51  ;;  %v2169_v21 = vsub.f32 %v4446_v13, %v2132_v51 }
 0x8ac   :  { %v4570_v62 = vpop.eup %3247  ;;  %3261 = vpow2.f32 %v2218_v3  ;;  %2260 = vadd.xlane.f32.xlu1 %v2259_v58 }
 0x8ad   :  { %v4572_v0 = vpop.eup %3249  ;;  %v2220_v55 = vmul.f32 1.442695, %v2168_v14  ;;  %v2222_v54 = vmul.f32 1.442695, %v2169_v21  ;;  %v2478_v14 = vsel %vm1303_vm1, %v4151_v20, %v4350_v49 }
 0x8ae   :  { %v2135_v53 = vpop.xlane.xlu1 %2134  ;;  %v2262_v8 = vadd.f32 %v4572_v0, %v4570_v62 }
 0x8af   :  { %3263 = vpow2.f32 %v2220_v55  ;;  %v2170_v32 = vsub.f32 %v4451_v10, %v2135_v53  ;;  %v2171_v60 = vsub.f32 %v4454_v17, %v2135_v53 }
 0x8b0   :  { %v4578_v11 = vpop.eup %3251  ;;  %3265 = vpow2.f32 %v2222_v54  ;;  %2263 = vadd.xlane.f32.xlu0 %v2262_v8 }
 0x8b1   :  { %v4580_v13 = vpop.eup %3253  ;;  %v2224_v4 = vmul.f32 1.442695, %v2170_v32  ;;  %v2226_v56 = vmul.f32 1.442695, %v2171_v60  ;;  %v2477_v60 = vsel %vm1303_vm1, %v4139_v15, %v4502_v37 }
 0x8b2   :  { %v2138_v26 = vpop.xlane.xlu0 %2137  ;;  %v2265_v30 = vadd.f32 %v4580_v13, %v4578_v11 }
 0x8b3   :  { %3267 = vpow2.f32 %v2224_v4  ;;  %v2172_v47 = vsub.f32 %v4459_v45, %v2138_v26  ;;  %v2173_v12 = vsub.f32 %v4462_v22, %v2138_v26 }
 0x8b4   :  { %v4586_v10 = vpop.eup %3255  ;;  %3269 = vpow2.f32 %v2226_v56  ;;  %2266 = vadd.xlane.f32.xlu1 %v2265_v30  ;;  %v2479_v30 = vsel %vm1303_vm1, %v4154_v23, %v4498_v24 }
 0x8b5   :  { %v4588_v17 = vpop.eup %3257  ;;  %v2228_v27 = vmul.f32 1.442695, %v2172_v47  ;;  %v2230_v52 = vmul.f32 1.442695, %v2173_v12 }
 0x8b6   :  { %v2141_v29 = vpop.xlane.xlu1 %2140  ;;  %v2268_v35 = vadd.f32 %v4588_v17, %v4586_v10 }
 0x8b7   :  { %3271 = vpow2.f32 %v2228_v27  ;;  %v2174_v43 = vsub.f32 %v4467_v38, %v2141_v29  ;;  %v2175_v3 = vsub.f32 %v4470_v40, %v2141_v29 }
 0x8b8   :  { %v4594_v45 = vpop.eup %3259  ;;  %3273 = vpow2.f32 %v2230_v52  ;;  %2269 = vadd.xlane.f32.xlu0 %v2268_v35  ;;  %v2481_v52 = vsel %vm1303_vm1, %v4169_v33, %v4510_v7 }
 0x8b9   :  { %v4596_v22 = vpop.eup %3261  ;;  %v2232_v51 = vmul.f32 1.442695, %v2174_v43  ;;  %v2234_v58 = vmul.f32 1.442695, %v2175_v3 }
 0x8ba   :  { %v2441_v21 = vpop.permute.xlu1 %2440  ;;  %v2144_v55 = vpop.xlane.xlu0 %2143  ;;  %v2271_v54 = vadd.f32 %v4596_v22, %v4594_v45 }
 0x8bb   :  { %3275 = vpow2.f32 %v2232_v51  ;;  %v2494_v38 = vsel %vm726_vm0, %v2478_v14, %v2441_v21  ;;  %v2176_v40 = vsub.f32 %v4475_v41, %v2144_v55  ;;  %v2177_v53 = vsub.f32 %v4478_v57, %v2144_v55 }
 0x8bc   :  { %v4606_v8 = vpop.eup %3263  ;;  %3277 = vpow2.f32 %v2234_v58  ;;  %2510 = vst [vmem:[#allocation17 + $0x50] sm:$0xff] %v2494_v38  ;;  %2272 = vadd.xlane.f32.xlu1 %v2271_v54  ;;  %v2480_v38 = vsel %vm1303_vm1, %v4166_v18, %v4508_v50 }
 0x8bd   :  { %v4608_v32 = vpop.eup %3265  ;;  %v2236_v20 = vmul.f32 1.442695, %v2176_v40  ;;  %v2238_v49 = vmul.f32 1.442695, %v2177_v53 }
 0x8be   :  { %v2439_v4 = vpop.permute.xlu0 %2438  ;;  %v2274_v56 = vadd.f32 %v4608_v32, %v4606_v8 }
 0x8bf   :  { %3279 = vpow2.f32 %v2236_v20  ;;  %v2493_v41 = vsel %vm726_vm0, %v2477_v60, %v2439_v4 }
 0x8c0   :  { %v4616_v57 = vpop.eup %3267  ;;  %3281 = vpow2.f32 %v2238_v49  ;;  %2509 = vst [vmem:[#allocation17 + $0x48] sm:$0xff] %v2493_v41  ;;  %2275 = vadd.xlane.f32.xlu0 %v2274_v56 }
 0x8c1   :  { %v4618_v26 = vpop.eup %3269 }
 0x8c2   :  { %v2443_v47 = vpop.permute.xlu0 %2442  ;;  %v2277_v15 = vadd.f32 %v4618_v26, %v4616_v57 }
 0x8c3   :  { %v2495_v37 = vsel %vm726_vm0, %v2479_v30, %v2443_v47 }
 0x8c4   :  { %v4626_v12 = vpop.eup %3271  ;;  %2511 = vst [vmem:[#allocation17 + $0x58] sm:$0xff] %v2495_v37  ;;  %2278 = vadd.xlane.f32.xlu1 %v2277_v15 }
 0x8c5   :  { %v4628_v27 = vpop.eup %3273 }
 0x8c6   :  { %v2447_v29 = vpop.permute.xlu0 %2446  ;;  %v2280_v23 = vadd.f32 %v4628_v27, %v4626_v12 }
 0x8c7   :  { %v2497_v24 = vsel %vm726_vm0, %v2481_v52, %v2447_v29 }
 0x8c8   :  { %v4636_v35 = vpop.eup %3275  ;;  %2513 = vst [vmem:[#allocation17 + $0x68] sm:$0xff] %v2497_v24  ;;  %2281 = vadd.xlane.f32.xlu0 %v2280_v23 }
 0x8c9   :  { %v4638_v43 = vpop.eup %3277 }
 0x8ca   :  { %v2283_v3 = vadd.f32 %v4638_v43, %v4636_v35 }
 0x8cc   :  { %v4642_v51 = vpop.eup %3279  ;;  %2284 = vadd.xlane.f32.xlu1 %v2283_v3 }
 0x8cd   :  { %v4644_v58 = vpop.eup %3281 }
 0x8ce   :  { %v2286_v33 = vadd.f32 %v4644_v58, %v4642_v51 }
 0x8d0   :  { %2287 = vadd.xlane.f32.xlu0 %v2286_v33 }
 0x8e6   :  { %2450 = vrot.lane.b32.xlu0 %v4006_v61, %s3554_s21 }
 0x8eb   :  { %v2147_v7 = vpop.xlane.xlu1 %2146 }
 0x8ec   :  { %v2178_v14 = vsub.f32 %v4494_v5, %v2147_v7  ;;  %v2179_v21 = vsub.f32 %v4491_v34, %v2147_v7 }
 0x8ee   :  { %v2240_v55 = vmul.f32 1.442695, %v2178_v14  ;;  %v2242_v54 = vmul.f32 1.442695, %v2179_v21 }
 0x8ef   :  { %v2445_v40 = vpop.permute.xlu1 %2444 }
 0x8f0   :  { %3283 = vpow2.f32 %v2240_v55  ;;  %v2496_v53 = vsel %vm726_vm0, %v2480_v38, %v2445_v40 }
 0x8f1   :  { %3285 = vpow2.f32 %v2242_v54  ;;  %2512 = vst [vmem:[#allocation17 + $0x60] sm:$0xff] %v2496_v53 }
 0x8fd   :  { %v4656_v20 = vpop.eup %3283 }
 0x8fe   :  { %v4658_v61 = vpop.eup %3285 }
 0x8ff   :  { %v2289_v5 = vadd.f32 %v4658_v61, %v4656_v20 }
 0x901   :  { %2290 = vadd.xlane.f32.xlu1 %v2289_v5 }
 0x912   :  { %2448 = vrot.lane.b32.xlu1 %v3996_v48, %s3554_s21  ;;  %s2553_s21 = sshll.u32 %s3569_s13, 4  ;;  %s2554_s21 = int_to_ptr.vmem [resolvable:$true] %s2553_s21 }
 0x913   :  { %s3499_s6 = scalar_lea.vmem %s2554_s21, 2048  ;;  %p3504_p4 = scmp.lt.s32.totalorder %s2554_s21, %s2554_s21 }
 0x914   :  { %p3500_p3 = scmp.ne.s32.totalorder %s2554_s21, %s3499_s6  ;;  %p3505_p5 = scmp.lt.s32.totalorder %s3499_s6, %s3499_s6 }
 0x916   :  { %p3506_p6 = por %p3505_p5, %p3504_p4 }
 0x918   :  { %p3507_p7 = pnand %p3506_p6, %p3500_p3 }
 0x921   :  { %v2246_v34 = vpop.xlane.xlu0 %2245 }
 0x922   :  { %3287 = vrcp.f32 %v2246_v34 }
 0x925   :  { %v2249_v18 = vpop.xlane.xlu1 %2248 }
 0x926   :  { %3289 = vrcp.f32 %v2249_v18 }
 0x929   :  { %v2252_v50 = vpop.xlane.xlu0 %2251 }
 0x92a   :  { %3291 = vrcp.f32 %v2252_v50 }
 0x92d   :  { %v2255_v49 = vpop.xlane.xlu1 %2254 }
 0x92e   :  { %3293 = vrcp.f32 %v2255_v49 }
 0x92f   :  { %v3288_v60 = vpop.eup %3287 }
 0x930   :  { %v2293_v4 = vmul.f32 %v3288_v60, %v4522_v63  ;;  %v2294_v56 = vmul.f32 %v3288_v60, %v4524_v19 }
 0x931   :  { %v2258_v41 = vpop.xlane.xlu0 %2257 }
 0x932   :  { %2516 = vst [vmem:[#allocation18] sm:$0xff] %v2293_v4  ;;  %2517 = vst [vmem:[#allocation18 + $0x8] sm:$0xff] %v2294_v56  ;;  %3295 = vrcp.f32 %v2258_v41 }
 0x933   :  { %v3290_v30 = vpop.eup %3289 }
 0x934   :  { %v2296_v48 = vmul.f32 %v3290_v30, %v4530_v39  ;;  %v2297_v47 = vmul.f32 %v3290_v30, %v4532_v28 }
 0x935   :  { %v2261_v15 = vpop.xlane.xlu1 %2260 }
 0x936   :  { %2518 = vst [vmem:[#allocation18 + $0x10] sm:$0xff] %v2296_v48  ;;  %2519 = vst [vmem:[#allocation18 + $0x18] sm:$0xff] %v2297_v47  ;;  %3297 = vrcp.f32 %v2261_v15 }
 0x937   :  { %v3292_v37 = vpop.eup %3291 }
 0x938   :  { %v2299_v52 = vmul.f32 %v3292_v37, %v4538_v36  ;;  %v2300_v63 = vmul.f32 %v3292_v37, %v4540_v31 }
 0x939   :  { %v2264_v29 = vpop.xlane.xlu0 %2263 }
 0x93a   :  { %2520 = vst [vmem:[#allocation18 + $0x20] sm:$0xff] %v2299_v52  ;;  %2521 = vst [vmem:[#allocation18 + $0x28] sm:$0xff] %v2300_v63  ;;  %3299 = vrcp.f32 %v2264_v29 }
 0x93b   :  { %v3294_v19 = vpop.eup %3293 }
 0x93c   :  { %v2302_v23 = vmul.f32 %v3294_v19, %v4546_v16  ;;  %v2303_v39 = vmul.f32 %v3294_v19, %v4548_v9 }
 0x93d   :  { %v2267_v24 = vpop.xlane.xlu1 %2266 }
 0x93e   :  { %2522 = vst [vmem:[#allocation18 + $0x30] sm:$0xff] %v2302_v23  ;;  %2523 = vst [vmem:[#allocation18 + $0x38] sm:$0xff] %v2303_v39  ;;  %3301 = vrcp.f32 %v2267_v24 }
 0x93f   :  { %v3296_v28 = vpop.eup %3295 }
 0x940   :  { %v2305_v3 = vmul.f32 %v3296_v28, %v4554_v25  ;;  %v2306_v36 = vmul.f32 %v3296_v28, %v4556_v46 }
 0x941   :  { %v2270_v33 = vpop.xlane.xlu0 %2269 }
 0x942   :  { %2524 = vst [vmem:[#allocation18 + $0x40] sm:$0xff] %v2305_v3  ;;  %2525 = vst [vmem:[#allocation18 + $0x48] sm:$0xff] %v2306_v36  ;;  %3303 = vrcp.f32 %v2270_v33 }
 0x943   :  { %v3298_v31 = vpop.eup %3297 }
 0x944   :  { %v2308_v7 = vmul.f32 %v3298_v31, %v4562_v6  ;;  %v2309_v16 = vmul.f32 %v3298_v31, %v4564_v59 }
 0x945   :  { %v2273_v14 = vpop.xlane.xlu1 %2272 }
 0x946   :  { %2526 = vst [vmem:[#allocation18 + $0x50] sm:$0xff] %v2308_v7  ;;  %2527 = vst [vmem:[#allocation18 + $0x58] sm:$0xff] %v2309_v16  ;;  %3305 = vrcp.f32 %v2273_v14 }
 0x947   :  { %v3300_v9 = vpop.eup %3299 }
 0x948   :  { %v2311_v21 = vmul.f32 %v3300_v9, %v4570_v62  ;;  %v2312_v25 = vmul.f32 %v3300_v9, %v4572_v0 }
 0x949   :  { %v2276_v55 = vpop.xlane.xlu0 %2275 }
 0x94a   :  { %2528 = vst [vmem:[#allocation18 + $0x60] sm:$0xff] %v2311_v21  ;;  %2529 = vst [vmem:[#allocation18 + $0x68] sm:$0xff] %v2312_v25  ;;  %3307 = vrcp.f32 %v2276_v55 }
 0x94b   :  { %v3302_v46 = vpop.eup %3301 }
 0x94c   :  { %v2314_v54 = vmul.f32 %v3302_v46, %v4578_v11  ;;  %v2315_v6 = vmul.f32 %v3302_v46, %v4580_v13 }
 0x94d   :  { %v2279_v38 = vpop.xlane.xlu1 %2278 }
 0x94e   :  { %2530 = vst [vmem:[#allocation18 + $0x70] sm:$0xff] %v2314_v54  ;;  %2531 = vst [vmem:[#allocation18 + $0x78] sm:$0xff] %v2315_v6  ;;  %3309 = vrcp.f32 %v2279_v38 }
 0x94f   :  { %v3304_v59 = vpop.eup %3303 }
 0x950   :  { %v2317_v40 = vmul.f32 %v3304_v59, %v4586_v10  ;;  %v2318_v62 = vmul.f32 %v3304_v59, %v4588_v17 }
 0x951   :  { %v2282_v53 = vpop.xlane.xlu0 %2281 }
 0x952   :  { %2532 = vst [vmem:[#allocation18 + $0x80] sm:$0xff] %v2317_v40  ;;  %2533 = vst [vmem:[#allocation18 + $0x88] sm:$0xff] %v2318_v62  ;;  %3311 = vrcp.f32 %v2282_v53 }
 0x953   :  { %v3306_v0 = vpop.eup %3305 }
 0x954   :  { %v2320_v5 = vmul.f32 %v3306_v0, %v4594_v45  ;;  %v2321_v11 = vmul.f32 %v3306_v0, %v4596_v22  ;;  %v2483_v22 = vsel %vm1303_vm1, %v4178_v1, %v4506_v2 }
 0x955   :  { %v2285_v34 = vpop.xlane.xlu1 %2284 }
 0x956   :  { %2534 = vst [vmem:[#allocation18 + $0x90] sm:$0xff] %v2320_v5  ;;  %2535 = vst [vmem:[#allocation18 + $0x98] sm:$0xff] %v2321_v11  ;;  %3313 = vrcp.f32 %v2285_v34 }
 0x957   :  { %v3308_v13 = vpop.eup %3307 }
 0x958   :  { %v2323_v18 = vmul.f32 %v3308_v13, %v4606_v8  ;;  %v2324_v10 = vmul.f32 %v3308_v13, %v4608_v32 }
 0x959   :  { %v2288_v50 = vpop.xlane.xlu0 %2287 }
 0x95a   :  { %2536 = vst [vmem:[#allocation18 + $0xa0] sm:$0xff] %v2323_v18  ;;  %2537 = vst [vmem:[#allocation18 + $0xa8] sm:$0xff] %v2324_v10  ;;  %3315 = vrcp.f32 %v2288_v50 }
 0x95b   :  { %v3310_v17 = vpop.eup %3309 }
 0x95c   :  { %v2326_v49 = vmul.f32 %v3310_v17, %v4616_v57  ;;  %v2327_v45 = vmul.f32 %v3310_v17, %v4618_v26 }
 0x95d   :  { %v2451_v60 = vpop.permute.xlu0 %2450 }
 0x95e   :  { %2538 = vst [vmem:[#allocation18 + $0xb0] sm:$0xff] %v2326_v49  ;;  %2539 = vst [vmem:[#allocation18 + $0xb8] sm:$0xff] %v2327_v45  ;;  %v2499_v8 = vsel %vm726_vm0, %v2483_v22, %v2451_v60 }
 0x95f   :  { %v3312_v4 = vpop.eup %3311  ;;  %2515 = vst [vmem:[#allocation17 + $0x78] sm:$0xff] %v2499_v8 }
 0x960   :  { %v2329_v32 = vmul.f32 %v3312_v4, %v4626_v12  ;;  %v2330_v56 = vmul.f32 %v3312_v4, %v4628_v27  ;;  %v2482_v12 = vsel %vm1303_vm1, %v4175_v44, %v4504_v42 }
 0x962   :  { %2540 = vst [vmem:[#allocation18 + $0xc0] sm:$0xff] %v2329_v32  ;;  %2541 = vst [vmem:[#allocation18 + $0xc8] sm:$0xff] %v2330_v56 }
 0x963   :  { %v3314_v57 = vpop.eup %3313 }
 0x964   :  { %v2332_v26 = vmul.f32 %v3314_v57, %v4636_v35  ;;  %v2333_v41 = vmul.f32 %v3314_v57, %v4638_v43 }
 0x966   :  { %2542 = vst [vmem:[#allocation18 + $0xd0] sm:$0xff] %v2332_v26  ;;  %2543 = vst [vmem:[#allocation18 + $0xd8] sm:$0xff] %v2333_v41 }
 0x967   :  { %v3316_v1 = vpop.eup %3315 }
 0x968   :  { %v2335_v2 = vmul.f32 %v3316_v1, %v4642_v51  ;;  %v2336_v30 = vmul.f32 %v3316_v1, %v4644_v58 }
 0x96a   :  { %2544 = vst [vmem:[#allocation18 + $0xe0] sm:$0xff] %v2335_v2  ;;  %2545 = vst [vmem:[#allocation18 + $0xe8] sm:$0xff] %v2336_v30 }
 0x98a   :  { %v2291_v48 = vpop.xlane.xlu1 %2290 }
 0x98b   :  { %3317 = vrcp.f32 %v2291_v48 }
 0x98e   :  { %v2449_v27 = vpop.permute.xlu1 %2448 }
 0x98f   :  { %v2498_v35 = vsel %vm726_vm0, %v2482_v12, %v2449_v27 }
 0x990   :  { %2514 = vst [vmem:[#allocation17 + $0x70] sm:$0xff] %v2498_v35 }
 0x991   :  { %3510 = shalt.err (!%p3507_p7)
}
 0x992   :  { %2559 = dma.vmem_to_hbm [thread:$0]  %s2554_s21, 2048, %s4727_s14, [#allocation4], %s3560_s8, %s3560_s8, %s3561_s22  }
 0x993   :  { %s3570_s25 = smov [#allocation18]  }
 0x994   :  { %s2565_s26 = sshll.u32 %s3570_s25, 4  ;;  %s2566_s26 = int_to_ptr.vmem [resolvable:$true] %s2565_s26 }
 0x995   :  { %s3519_s27 = scalar_lea.vmem %s2566_s26, 4096  ;;  %p3524_p9 = scmp.lt.s32.totalorder %s2566_s26, %s2566_s26 }
 0x996   :  { %p3520_p8 = scmp.ne.s32.totalorder %s2566_s26, %s3519_s27  ;;  %p3525_p10 = scmp.lt.s32.totalorder %s3519_s27, %s3519_s27 }
 0x998   :  { %v3318_v44 = vpop.eup %3317  ;;  %p3526_p11 = por %p3525_p10, %p3524_p9 }
 0x999   :  { %v2338_v42 = vmul.f32 %v3318_v44, %v4656_v20  ;;  %v2339_v43 = vmul.f32 %v3318_v44, %v4658_v61 }
 0x99a   :  { %p3527_p12 = pnand %p3526_p11, %p3520_p8 }
 0x99b   :  { %2546 = vst [vmem:[#allocation18 + $0xf0] sm:$0xff] %v2338_v42  ;;  %2547 = vst [vmem:[#allocation18 + $0xf8] sm:$0xff] %v2339_v43 }
 0x99c   :  { %3530 = shalt.err (!%p3527_p12)
}
 0x99d   :  { %s3571_s29 = smov 256   ;;  %s3572_s28 = smov 16  }
 0x99e   :  { %2571 = dma.vmem_to_hbm [thread:$0]  %s2566_s26, 4096, %s4728_s15, [#allocation19], %s3571_s29, %s3571_s29, %s3572_s28  }
 0x99f   :  { %3549 = dma.done.wait [#allocation4], 2048  }
 0x9a0   :  { %3550 = vsyncadd [#allocation4], 4294965248 }
 0x9a1   :  { %3551 = dma.done.wait [#allocation19], 4096  }
 0x9a2   :  { %3552 = vsyncadd [#allocation19], 4294963200 }
 0x9a3   :  { %2578 = vsyncpa [#allocation3], 1 }
 0x9a4   :  { %2579 = vsyncpa [#allocation6], 1 }
 0x9a5   :  { %2580 = vsyncpa [#allocation9], 1 }
 0x9a6   :  { %2581 = vsyncpa [#allocation12], 1 }
 0x9a7   :  { %2582 = vsyncpa [#allocation15], 1 }
 0x9a8   :  { %2583 = vsyncpa [#allocation4], 1 }
 0x9a9   :  { %2584 = vsyncpa [#allocation19], 1 }

</bundles_post_ra>
